<compile_context>
chip_gen: v7x
topology: tpu7x:2x2x1
jax: 0.10.0
libtpu: 0.0.40
codegen_flags: <defaults>
</compile_context>

<pallas_src>
import jax
import jax.numpy as jnp
from jax.experimental import pallas as pl
from jax.experimental.pallas import tpu as pltpu


def _code_disc_kernel(xT_ref, w1_ref, b1_ref, w2_ref, b2_ref, w3c_ref, b3_ref,
                      o_ref):
    """3-layer MLP, transposed layout: features on sublanes, batch on lanes."""
    # x tile, [code_size, TB]; cast to bf16 so both MXU operands are bf16.
    xT = xT_ref[...].astype(jnp.bfloat16)

    # ----- layer 1: h1^T = W1 @ x^T  (W1: [U, C] bf16) -> [U, TB], f32 acc -----
    h1 = jnp.dot(w1_ref[...], xT, preferred_element_type=jnp.float32)
    h1 = h1 + b1_ref[...]                      # b1: [U, 1] broadcasts over lanes
    h1 = jnp.where(h1 > 0, h1, 0.2 * h1)       # LeakyReLU(0.2)

    # ----- layer 2: h2^T = W2 @ h1^T -> [U, TB], f32 acc -----
    h2 = jnp.dot(w2_ref[...], h1.astype(jnp.bfloat16),
                 preferred_element_type=jnp.float32)
    h2 = h2 + b2_ref[...]
    h2 = jnp.where(h2 > 0, h2, 0.2 * h2)

    # ----- layer 3: out_features == 1 -> VPU multiply + sublane reduce -----
    # (avoids pushing a full vmatmul through the MXU for a single lane)
    y = jnp.sum(h2 * w3c_ref[...], axis=0, keepdims=True)    # [1, TB]
    y = y + b3_ref[0, 0]                                      # scalar bias (SMEM)

    o_ref[...] = y.astype(o_ref.dtype)         # lane-dense [1, TB] store


def code_discriminator_pallas(x, params, *, tile_b=128):
    """x: [B, code_size] f32.  params: dict of spectrally-normalized weights."""
    B, code_size = x.shape
    num_units = params["w1"].shape[0]

    n_tiles = pl.cdiv(B, tile_b)
    b_pad = n_tiles * tile_b

    # Transposed, zero-padded input: [code_size, B_pad], batch on the lane axis.
    xT = jnp.pad(x.T, ((0, 0), (0, b_pad - B)))

    flops = 2 * b_pad * (code_size * num_units + num_units * num_units
                         + num_units)
    bytes_accessed = (
        int(xT.size) * xT.dtype.itemsize
        + sum(int(p.size) * p.dtype.itemsize for p in params.values())
        + b_pad * 4)

    out = pl.pallas_call(
        _code_disc_kernel,
        out_shape=jax.ShapeDtypeStruct((1, b_pad), jnp.float32),
        grid=(n_tiles,),
        in_specs=[
            pl.BlockSpec((code_size, tile_b), lambda i: (0, i)),     # x^T tile
            pl.BlockSpec((num_units, code_size), lambda i: (0, 0)),  # W1 resident
            pl.BlockSpec((num_units, 1), lambda i: (0, 0)),          # b1
            pl.BlockSpec((num_units, num_units), lambda i: (0, 0)),  # W2 resident
            pl.BlockSpec((num_units, 1), lambda i: (0, 0)),          # b2
            pl.BlockSpec((num_units, 1), lambda i: (0, 0)),          # w3 column
            pl.BlockSpec(memory_space=pltpu.MemorySpace.SMEM),       # b3 scalar
        ],
        out_specs=pl.BlockSpec((1, tile_b), lambda i: (0, i)),
        compiler_params=pltpu.CompilerParams(
            dimension_semantics=("parallel",)),
        cost_estimate=pl.CostEstimate(
            flops=flops, transcendentals=0, bytes_accessed=bytes_accessed),
    )(xT, params["w1"], params["b1"], params["w2"], params["b2"],
      params["w3c"], params["b3"])

    # Back to the module's [B, 1] output layout.
    return out[0, :B].reshape(B, 1)


# ------------------------- parameter setup (glue) ---------------------------

def _spectral_normalize(w, key, n_power_iterations=1, eps=1e-12):
    """W / sigma_max(W), sigma estimated with power iteration (PyTorch-style)."""
    u = jax.random.normal(key, (w.shape[0],), dtype=w.dtype)
    u = u / (jnp.linalg.norm(u) + eps)
    v = None
    for _ in range(n_power_iterations):
        v = w.T @ u
        v = v / (jnp.linalg.norm(v) + eps)
        u = w @ v
        u = u / (jnp.linalg.norm(u) + eps)
    sigma = u @ (w @ v)
    return w / sigma


def init_code_discriminator_params(key, code_size, num_units=256):
    ks = jax.random.split(key, 9)
    # PyTorch nn.Linear weight is [out_features, in_features].
    w1 = 0.05 * jax.random.normal(ks[0], (num_units, code_size), jnp.float32)
    b1 = 0.05 * jax.random.normal(ks[1], (num_units,), jnp.float32)
    w2 = 0.05 * jax.random.normal(ks[2], (num_units, num_units), jnp.float32)
    b2 = 0.05 * jax.random.normal(ks[3], (num_units,), jnp.float32)
    w3 = 0.05 * jax.random.normal(ks[4], (1, num_units), jnp.float32)
    b3 = 0.05 * jax.random.normal(ks[5], (1,), jnp.float32)

    # TODO(synk): PyTorch SNLinear keeps a persistent power-iteration `u`
    # updated every forward; here sigma is approximated with one iteration
    # from a deterministic random start at init time.
    w1 = _spectral_normalize(w1, ks[6])
    w2 = _spectral_normalize(w2, ks[7])
    w3 = _spectral_normalize(w3, ks[8])

    return {
        # Weights stay in the PyTorch [out, in] layout (kernel runs transposed),
        # cast to bf16 to halve weight DMA and feed the bf16 MXU natively.
        "w1": w1.astype(jnp.bfloat16), "b1": b1.reshape(num_units, 1),
        "w2": w2.astype(jnp.bfloat16), "b2": b2.reshape(num_units, 1),
        # Layer-3 weight kept as an f32 column for the in-kernel reduction.
        "w3c": w3.reshape(num_units, 1),
        "b3": b3.reshape(1, 1),
    }


def code_discriminator_ref(x, params):
    """Pure-JAX reference (f32 math on the bf16-stored weights)."""
    w1 = params["w1"].astype(jnp.float32)
    w2 = params["w2"].astype(jnp.float32)
    h1 = x @ w1.T + params["b1"].reshape(1, -1)
    h1 = jnp.where(h1 > 0, h1, 0.2 * h1)
    h2 = h1 @ w2.T + params["b2"].reshape(1, -1)
    h2 = jnp.where(h2 > 0, h2, 0.2 * h2)
    return h2 @ params["w3c"] + params["b3"]


if __name__ == "__main__":
    key = jax.random.PRNGKey(0)
    k_x, k_p = jax.random.split(key)

    batch = 2
    code_size = 32       # latent code dimension (module arg)
    num_units = 256      # module default

    x = jax.random.normal(k_x, (batch, code_size), jnp.float32)
    params = init_code_discriminator_params(k_p, code_size, num_units)

    out = code_discriminator_pallas(x, params)
    out = jax.block_until_ready(out)

    ref = code_discriminator_ref(x, params)
    assert out.shape == (batch, 1), out.shape
    assert jnp.allclose(out, ref, atol=2e-2, rtol=2e-2), (out, ref)

    print("KERNEL_OK")
</pallas_src>

<mosaic_0001>
module attributes {stable_mosaic.version = 11 : i64} {
  func.func @_code_disc_kernel(%arg0: i32, %arg1: memref<32x128xf32, #tpu.memory_space<vmem>>, %arg2: memref<256x32xbf16, #tpu.memory_space<vmem>>, %arg3: memref<256x1xf32, #tpu.memory_space<vmem>>, %arg4: memref<256x256xbf16, #tpu.memory_space<vmem>>, %arg5: memref<256x1xf32, #tpu.memory_space<vmem>>, %arg6: memref<256x1xf32, #tpu.memory_space<vmem>>, %arg7: memref<1x1xf32, #tpu.memory_space<smem>>, %arg8: memref<1x128xf32, #tpu.memory_space<vmem>>) attributes {dimension_semantics = [#tpu.dimension_semantics<parallel>], iteration_bounds = array<i64: 1>, scalar_prefetch = 0 : i64, scratch_operands = 0 : i64, tpu.core_type = #tpu.core_type<tc>, window_params = [{transform_indices = @transform_0, window_bounds = array<i64: 32, 128>}, {pipeline_mode = #tpu.pipeline_mode<synchronous>, transform_indices = @transform_1, window_bounds = array<i64: 256, 32>}, {pipeline_mode = #tpu.pipeline_mode<synchronous>, transform_indices = @transform_2, window_bounds = array<i64: 256, 1>}, {pipeline_mode = #tpu.pipeline_mode<synchronous>, transform_indices = @transform_3, window_bounds = array<i64: 256, 256>}, {pipeline_mode = #tpu.pipeline_mode<synchronous>, transform_indices = @transform_4, window_bounds = array<i64: 256, 1>}, {pipeline_mode = #tpu.pipeline_mode<synchronous>, transform_indices = @transform_5, window_bounds = array<i64: 256, 1>}, {transform_indices = @transform_6, window_bounds = array<i64: 1, 1>}, {transform_indices = @transform_7, window_bounds = array<i64: 1, 128>}]} {
    %c0 = arith.constant 0 : index
    %c0_0 = arith.constant 0 : index
    %0 = vector.load %arg1[%c0, %c0_0] : memref<32x128xf32, #tpu.memory_space<vmem>>, vector<32x128xf32>
    %1 = arith.truncf %0 : vector<32x128xf32> to vector<32x128xbf16>
    %c0_1 = arith.constant 0 : index
    %c0_2 = arith.constant 0 : index
    %2 = vector.load %arg2[%c0_1, %c0_2] : memref<256x32xbf16, #tpu.memory_space<vmem>>, vector<256x32xbf16>
    %cst = arith.constant dense<0.000000e+00> : vector<256x128xf32>
    %3 = tpu.matmul %2, %1, %cst {dimension_numbers = #tpu.dot_dimension_numbers<[1], [0], [0], [1], [0, 0, 1, 1], [], []>} : vector<256x32xbf16>, vector<32x128xbf16>, vector<256x128xf32> -> vector<256x128xf32>
    %c0_3 = arith.constant 0 : index
    %c0_4 = arith.constant 0 : index
    %4 = vector.load %arg3[%c0_3, %c0_4] : memref<256x1xf32, #tpu.memory_space<vmem>>, vector<256x1xf32>
    %5 = vector.broadcast %4 : vector<256x1xf32> to vector<256x128xf32>
    %6 = arith.addf %3, %5 : vector<256x128xf32>
    %cst_5 = arith.constant 0.000000e+00 : f32
    %7 = vector.broadcast %cst_5 : f32 to vector<256x128xf32>
    %8 = arith.cmpf ogt, %6, %7 : vector<256x128xf32>
    %cst_6 = arith.constant 2.000000e-01 : f32
    %9 = vector.broadcast %cst_6 : f32 to vector<256x128xf32>
    %10 = arith.mulf %9, %6 : vector<256x128xf32>
    %11 = arith.select %8, %6, %10 : vector<256x128xi1>, vector<256x128xf32>
    %c0_7 = arith.constant 0 : index
    %c0_8 = arith.constant 0 : index
    %12 = vector.load %arg4[%c0_7, %c0_8] : memref<256x256xbf16, #tpu.memory_space<vmem>>, vector<256x256xbf16>
    %13 = arith.truncf %11 : vector<256x128xf32> to vector<256x128xbf16>
    %cst_9 = arith.constant dense<0.000000e+00> : vector<256x128xf32>
    %14 = tpu.matmul %12, %13, %cst_9 {dimension_numbers = #tpu.dot_dimension_numbers<[1], [0], [0], [1], [0, 0, 1, 1], [], []>} : vector<256x256xbf16>, vector<256x128xbf16>, vector<256x128xf32> -> vector<256x128xf32>
    %c0_10 = arith.constant 0 : index
    %c0_11 = arith.constant 0 : index
    %15 = vector.load %arg5[%c0_10, %c0_11] : memref<256x1xf32, #tpu.memory_space<vmem>>, vector<256x1xf32>
    %16 = vector.broadcast %15 : vector<256x1xf32> to vector<256x128xf32>
    %17 = arith.addf %14, %16 : vector<256x128xf32>
    %cst_12 = arith.constant 0.000000e+00 : f32
    %18 = vector.broadcast %cst_12 : f32 to vector<256x128xf32>
    %19 = arith.cmpf ogt, %17, %18 : vector<256x128xf32>
    %cst_13 = arith.constant 2.000000e-01 : f32
    %20 = vector.broadcast %cst_13 : f32 to vector<256x128xf32>
    %21 = arith.mulf %20, %17 : vector<256x128xf32>
    %22 = arith.select %19, %17, %21 : vector<256x128xi1>, vector<256x128xf32>
    %c0_14 = arith.constant 0 : index
    %c0_15 = arith.constant 0 : index
    %23 = vector.load %arg6[%c0_14, %c0_15] : memref<256x1xf32, #tpu.memory_space<vmem>>, vector<256x1xf32>
    %24 = vector.broadcast %23 : vector<256x1xf32> to vector<256x128xf32>
    %25 = arith.mulf %22, %24 : vector<256x128xf32>
    %cst_16 = arith.constant dense<0.000000e+00> : vector<128xf32>
    %26 = vector.multi_reduction <add>, %25, %cst_16 [0] : vector<256x128xf32> to vector<128xf32>
    %27 = vector.shape_cast %26 : vector<128xf32> to vector<1x128xf32>
    %c0_17 = arith.constant 0 : index
    %c0_18 = arith.constant 0 : index
    %28 = memref.load %arg7[%c0_17, %c0_18] : memref<1x1xf32, #tpu.memory_space<smem>>
    %29 = vector.broadcast %28 : f32 to vector<1x128xf32>
    %30 = arith.addf %27, %29 : vector<1x128xf32>
    %c0_19 = arith.constant 0 : index
    %c0_20 = arith.constant 0 : index
    %31 = vector.load %arg8[%c0_19, %c0_20] : memref<1x128xf32, #tpu.memory_space<vmem>>, vector<1x128xf32>
    tpu.vector_store %arg8[%c0_19, %c0_20], %30 {strides = array<i32>} : memref<1x128xf32, #tpu.memory_space<vmem>>, vector<1x128xf32>,
    return
  }
  func.func @transform_0(%arg0: i32) -> (i32, i32) {
    %c0_i32 = arith.constant 0 : i32
    %c0_i32_0 = arith.constant 0 : i32
    return %c0_i32, %arg0 : i32, i32
  }
  func.func @transform_1(%arg0: i32) -> (i32, i32) {
    %c0_i32 = arith.constant 0 : i32
    %c0_i32_0 = arith.constant 0 : i32
    %c0_i32_1 = arith.constant 0 : i32
    return %c0_i32, %c0_i32_0 : i32, i32
  }
  func.func @transform_2(%arg0: i32) -> (i32, i32) {
    %c0_i32 = arith.constant 0 : i32
    %c0_i32_0 = arith.constant 0 : i32
    %c0_i32_1 = arith.constant 0 : i32
    return %c0_i32, %c0_i32_0 : i32, i32
  }
  func.func @transform_3(%arg0: i32) -> (i32, i32) {
    %c0_i32 = arith.constant 0 : i32
    %c0_i32_0 = arith.constant 0 : i32
    %c0_i32_1 = arith.constant 0 : i32
    return %c0_i32, %c0_i32_0 : i32, i32
  }
  func.func @transform_4(%arg0: i32) -> (i32, i32) {
    %c0_i32 = arith.constant 0 : i32
    %c0_i32_0 = arith.constant 0 : i32
    %c0_i32_1 = arith.constant 0 : i32
    return %c0_i32, %c0_i32_0 : i32, i32
  }
  func.func @transform_5(%arg0: i32) -> (i32, i32) {
    %c0_i32 = arith.constant 0 : i32
    %c0_i32_0 = arith.constant 0 : i32
    %c0_i32_1 = arith.constant 0 : i32
    return %c0_i32, %c0_i32_0 : i32, i32
  }
  func.func @transform_6(%arg0: i32) -> (i32, i32) {
    %c0_i32 = arith.constant 0 : i32
    %c0_i32_0 = arith.constant 0 : i32
    %c0_i32_1 = arith.constant 0 : i32
    return %c0_i32, %c0_i32_0 : i32, i32
  }
  func.func @transform_7(%arg0: i32) -> (i32, i32) {
    %c0_i32 = arith.constant 0 : i32
    %c0_i32_0 = arith.constant 0 : i32
    return %c0_i32, %arg0 : i32, i32
  }
}

</mosaic_0001>

<bundles_post_ra>
// kernel: tpu_custom_call.1
= control target key start
LH: loop header
LB: loop body
LE: loop exit
PB: predicated region body
PF: predicated region fallthrough
CT: control target
= control target key end

     0   :  { %v1919_v3 = vmov 0   ;;  %vm339_vm0 = vcmask 261120   ;;  %s2694_s0 = inlined_call_operand.vmem [shape: f32[32,128], index: 0, kind: input, shape index: {}]   ;;  %s2695_s1 = inlined_call_operand.vmem [shape: bf16[256,32], index: 1, kind: input, shape index: {}]   ;;  %s2696_s2 = inlined_call_operand.vmem [shape: f32[256,1], index: 2, kind: input, shape index: {}]   ;;  %s2697_s3 = inlined_call_operand.vmem [shape: bf16[256,256], index: 3, kind: input, shape index: {}]   ;;  %s2698_s4 = inlined_call_operand.vmem [shape: f32[256,1], index: 4, kind: input, shape index: {}]   ;;  %s2699_s5 = inlined_call_operand.vmem [shape: f32[256,1], index: 5, kind: input, shape index: {}]   ;;  %s2700_s6 = inlined_call_operand.<no memory space> [shape: f32[1,1], index: 6, kind: input, shape index: {}]   ;;  %s2701_s7 = inlined_call_operand.hbm [shape: f32[1,128], index: 7, kind: output, shape index: {}]  }
   0x1   :  { %v83_v0 = vld [vmem:[%s2696_s2 + $0x80] sm:$0xff]  ;;  %1830 = vset.pattern.permute.xlu1 %v1919_v3  ;;  %1829 = vset.pattern.permute.xlu0 %v1919_v3  ;;  %v30_v4 = vld [vmem:[%s2694_s0 + $0x8] sm:$0xff]  ;;  %v31_v7 = vld [vmem:[%s2694_s0 + $0x10] sm:$0xff] }
   0x2   :  { %v67_v1 = vld [vmem:[%s2696_s2] sm:$0xff]  ;;  %181 = vperm.xlu0 %1829, %v83_v0   ;;  %v84_v6 = vld [vmem:[%s2696_s2 + $0x88] sm:$0xff]  ;;  %v32_v8 = vld [vmem:[%s2694_s0 + $0x18] sm:$0xff] }
   0x3   :  { %v29_v2 = vld [vmem:[%s2694_s0] sm:$0xff]  ;;  %101 = vperm.xlu1 %1830, %v67_v1   ;;  %v68_v9 = vld [vmem:[%s2696_s2 + $0x8] sm:$0xff]  ;;  %v34_v10 = vpack.c.bf16 %v32_v8, %v31_v7  ;;  %v85_v12 = vld [vmem:[%s2696_s2 + $0x90] sm:$0xff] }
   0x4   :  { %v33_v5 = vpack.c.bf16 %v30_v4, %v29_v2  ;;  %v1831_v11 = vld [vmem:[%s2695_s1] sm:$0xff]   ;;  %v86_v13 = vld [vmem:[%s2696_s2 + $0x98] sm:$0xff]  ;;  %v1832_v14 = vld [vmem:[%s2695_s1 + $0x8] sm:$0xff]  }
   0x5   :  { %1779 = vmatprep.mubr.msk.bf16.mxu0 %vm339_vm0, %v1831_v11  ;;  %v1833_v15 = vld [vmem:[%s2695_s1 + $0x10] sm:$0xff]   ;;  %v70_v17 = vld [vmem:[%s2696_s2 + $0x18] sm:$0xff]  ;;  %v87_v18 = vld [vmem:[%s2696_s2 + $0xa0] sm:$0xff] }
   0x6   :  { %1775 = vmatprep.subr.bf16.mxu0 %v33_v5  ;;  %186 = vperm.xlu0 %1829, %v84_v6   ;;  %v69_v16 = vld [vmem:[%s2696_s2 + $0x10] sm:$0xff]  ;;  %v88_v19 = vld [vmem:[%s2696_s2 + $0xa8] sm:$0xff]  ;;  %v1834_v20 = vld [vmem:[%s2695_s1 + $0x18] sm:$0xff]  }
   0x7   :  { %1776 = vmatpush3.bf16.msra.mxu0 %v33_v5  ;;  %106 = vperm.xlu1 %1830, %v68_v9   ;;  %v1835_v21 = vld [vmem:[%s2695_s1 + $0x20] sm:$0xff]   ;;  %v72_v23 = vld [vmem:[%s2696_s2 + $0x28] sm:$0xff]  ;;  %v89_v24 = vld [vmem:[%s2696_s2 + $0xb0] sm:$0xff] }
   0x8   :  { %1777 = vmatprep.subr.bf16.mxu0 %v34_v10  ;;  %v71_v22 = vld [vmem:[%s2696_s2 + $0x20] sm:$0xff]  ;;  %v90_v25 = vld [vmem:[%s2696_s2 + $0xb8] sm:$0xff]  ;;  %v1836_v26 = vld [vmem:[%s2695_s1 + $0x28] sm:$0xff]  }
   0x9   :  { %v1837_v27 = vld [vmem:[%s2695_s1 + $0x30] sm:$0xff]   ;;  %v74_v29 = vld [vmem:[%s2696_s2 + $0x38] sm:$0xff]  ;;  %v91_v30 = vld [vmem:[%s2696_s2 + $0xc0] sm:$0xff] }
   0xa   :  { %191 = vperm.xlu0 %1829, %v85_v12   ;;  %v73_v28 = vld [vmem:[%s2696_s2 + $0x30] sm:$0xff]  ;;  %v92_v31 = vld [vmem:[%s2696_s2 + $0xc8] sm:$0xff]  ;;  %v1838_v32 = vld [vmem:[%s2695_s1 + $0x38] sm:$0xff]  }
   0xb   :  { %1778 = vmatpush3.bf16.msra.mxu0 %v34_v10  ;;  %196 = vperm.xlu1 %1830, %v86_v13   ;;  %v1839_v33 = vld [vmem:[%s2695_s1 + $0x40] sm:$0xff]   ;;  %v76_v35 = vld [vmem:[%s2696_s2 + $0x48] sm:$0xff]  ;;  %v93_v36 = vld [vmem:[%s2696_s2 + $0xd0] sm:$0xff] }
   0xc   :  { %v75_v34 = vld [vmem:[%s2696_s2 + $0x40] sm:$0xff]  ;;  %v94_v37 = vld [vmem:[%s2696_s2 + $0xd8] sm:$0xff]  ;;  %v1840_v38 = vld [vmem:[%s2695_s1 + $0x48] sm:$0xff]  }
   0xd   :  { %v1841_v39 = vld [vmem:[%s2695_s1 + $0x50] sm:$0xff]   ;;  %v78_v41 = vld [vmem:[%s2696_s2 + $0x58] sm:$0xff]  ;;  %v95_v42 = vld [vmem:[%s2696_s2 + $0xe0] sm:$0xff] }
   0xe   :  { %1780 = vmatmul.mubr.msk.bf16.vlgmr.msra.gmra.mrb[0].mxu0 %vm339_vm0, %v1832_v14  ;;  %111 = vperm.xlu0 %1829, %v69_v16   ;;  %v77_v40 = vld [vmem:[%s2696_s2 + $0x50] sm:$0xff]  ;;  %v96_v43 = vld [vmem:[%s2696_s2 + $0xe8] sm:$0xff]  ;;  %v1842_v44 = vld [vmem:[%s2695_s1 + $0x58] sm:$0xff]  }
   0xf   :  { %1783 = vmatprep.mubr.msk.bf16.mxu0 %vm339_vm0, %v1833_v15  ;;  %116 = vperm.xlu1 %1830, %v70_v17   ;;  %v79_v45 = vld [vmem:[%s2696_s2 + $0x60] sm:$0xff]  ;;  %v80_v47 = vld [vmem:[%s2696_s2 + $0x68] sm:$0xff]  ;;  %v97_v48 = vld [vmem:[%s2696_s2 + $0xf0] sm:$0xff] }
  0x10   :  { %v1843_v46 = vld [vmem:[%s2695_s1 + $0x60] sm:$0xff]   ;;  %v98_v49 = vld [vmem:[%s2696_s2 + $0xf8] sm:$0xff]  ;;  %v1844_v50 = vld [vmem:[%s2695_s1 + $0x68] sm:$0xff]  }
  0x11   :  { %v1845_v51 = vld [vmem:[%s2695_s1 + $0x70] sm:$0xff]   ;;  %v82_v53 = vld [vmem:[%s2696_s2 + $0x78] sm:$0xff] }
  0x12   :  { %201 = vperm.xlu0 %1829, %v87_v18   ;;  %v81_v52 = vld [vmem:[%s2696_s2 + $0x70] sm:$0xff] }
  0x13   :  { %206 = vperm.xlu1 %1830, %v88_v19  }
  0x16   :  { %1784 = vmatmul.mubr.msk.bf16.gmra.mrb[4].mxu0 %vm339_vm0, %v1834_v20  ;;  %121 = vperm.xlu0 %1829, %v71_v22  }
  0x17   :  { %1787 = vmatprep.mubr.msk.bf16.mxu0 %vm339_vm0, %v1835_v21  ;;  %126 = vperm.xlu1 %1830, %v72_v23  }
  0x1a   :  { %211 = vperm.xlu0 %1829, %v89_v24  }
  0x1b   :  { %216 = vperm.xlu1 %1830, %v90_v25  }
  0x1e   :  { %1788 = vmatmul.mubr.msk.bf16.gmra.mrb[8].mxu0 %vm339_vm0, %v1836_v26  ;;  %131 = vperm.xlu0 %1829, %v73_v28  }
  0x1f   :  { %1791 = vmatprep.mubr.msk.bf16.mxu0 %vm339_vm0, %v1837_v27  ;;  %136 = vperm.xlu1 %1830, %v74_v29  }
  0x22   :  { %221 = vperm.xlu0 %1829, %v91_v30  }
  0x23   :  { %226 = vperm.xlu1 %1830, %v92_v31  }
  0x26   :  { %1792 = vmatmul.mubr.msk.bf16.gmra.mrb[12].mxu0 %vm339_vm0, %v1838_v32  ;;  %141 = vperm.xlu0 %1829, %v75_v34  }
  0x27   :  { %1795 = vmatprep.mubr.msk.bf16.mxu0 %vm339_vm0, %v1839_v33  ;;  %146 = vperm.xlu1 %1830, %v76_v35  }
  0x2a   :  { %231 = vperm.xlu0 %1829, %v93_v36  }
  0x2b   :  { %236 = vperm.xlu1 %1830, %v94_v37  }
  0x2e   :  { %1796 = vmatmul.mubr.msk.bf16.gmra.mrb[16].mxu0 %vm339_vm0, %v1840_v38  ;;  %151 = vperm.xlu0 %1829, %v77_v40  }
  0x2f   :  { %1799 = vmatprep.mubr.msk.bf16.mxu0 %vm339_vm0, %v1841_v39  ;;  %156 = vperm.xlu1 %1830, %v78_v41  }
  0x32   :  { %241 = vperm.xlu0 %1829, %v95_v42  }
  0x33   :  { %246 = vperm.xlu1 %1830, %v96_v43  }
  0x36   :  { %1800 = vmatmul.mubr.msk.bf16.gmra.mrb[20].mxu0 %vm339_vm0, %v1842_v44  ;;  %161 = vperm.xlu0 %1829, %v79_v45  }
  0x37   :  { %1803 = vmatprep.mubr.msk.bf16.mxu0 %vm339_vm0, %v1843_v46  ;;  %166 = vperm.xlu1 %1830, %v80_v47  }
  0x3a   :  { %251 = vperm.xlu0 %1829, %v97_v48  }
  0x3b   :  { %256 = vperm.xlu1 %1830, %v98_v49  }
  0x3c   :  { %13 = vsyncpa [#allocation4], 0  ;;  %v693_v54 = vld [vmem:[%s2698_s4] sm:$0xff]  ;;  %v694_v55 = vld [vmem:[%s2698_s4 + $0x8] sm:$0xff]  ;;  %s1920_s13 = smov [#allocation3]  }
  0x3d   :  { %v1846_v56 = vld [vmem:[%s2695_s1 + $0x78] sm:$0xff]   ;;  %v695_v57 = vld [vmem:[%s2698_s4 + $0x10] sm:$0xff]  ;;  %v697_v59 = vld [vmem:[%s2698_s4 + $0x20] sm:$0xff]  ;;  %s1573_s14 = sshll.u32 %s1920_s13, 4  ;;  %s1574_s14 = int_to_ptr.vmem [resolvable:$true] %s1573_s14 }
  0x3e   :  { %1804 = vmatmul.mubr.msk.bf16.gmra.mrb[24].mxu0 %vm339_vm0, %v1844_v50  ;;  %171 = vperm.xlu0 %1829, %v81_v52   ;;  %v696_v58 = vld [vmem:[%s2698_s4 + $0x18] sm:$0xff]  ;;  %v698_v60 = vld [vmem:[%s2698_s4 + $0x28] sm:$0xff]  ;;  %v699_v61 = vld [vmem:[%s2698_s4 + $0x30] sm:$0xff]  ;;  %s1895_s15 = scalar_lea.vmem %s1574_s14, 16  ;;  %s1899_s16 = scalar_lea.vmem %s1574_s14, 32 }
  0x3f   :  { %1807 = vmatprep.mubr.msk.bf16.mxu0 %vm339_vm0, %v1845_v51  ;;  %176 = vperm.xlu1 %1830, %v82_v53   ;;  %v700_v62 = vld [vmem:[%s2698_s4 + $0x38] sm:$0xff]  ;;  %v701_v63 = vld [vmem:[%s2698_s4 + $0x40] sm:$0xff]  ;;  %v702_v0 = vld [vmem:[%s2698_s4 + $0x48] sm:$0xff]  ;;  %p1896_p0 = scmp.ne.s32.totalorder %s1574_s14, %s1895_s15  ;;  %p1900_p1 = scmp.lt.s32.totalorder %s1574_s14, %s1574_s14 }
  0x40   :  { %v703_v1 = vld [vmem:[%s2698_s4 + $0x50] sm:$0xff]  ;;  %v704_v2 = vld [vmem:[%s2698_s4 + $0x58] sm:$0xff]  ;;  %v705_v3 = vld [vmem:[%s2698_s4 + $0x60] sm:$0xff]  ;;  %p1901_p2 = scmp.lt.s32.totalorder %s1899_s16, %s1895_s15 }
  0x41   :  { %v706_v4 = vld [vmem:[%s2698_s4 + $0x68] sm:$0xff]  ;;  %v707_v5 = vld [vmem:[%s2698_s4 + $0x70] sm:$0xff]  ;;  %v708_v6 = vld [vmem:[%s2698_s4 + $0x78] sm:$0xff] }
  0x42   :  { %727 = vperm.xlu0 %1829, %v693_v54   ;;  %v709_v7 = vld [vmem:[%s2698_s4 + $0x80] sm:$0xff]  ;;  %v710_v8 = vld [vmem:[%s2698_s4 + $0x88] sm:$0xff]  ;;  %v711_v9 = vld [vmem:[%s2698_s4 + $0x90] sm:$0xff]  ;;  %p1902_p3 = por %p1901_p2, %p1900_p1 }
  0x43   :  { %732 = vperm.xlu1 %1830, %v694_v55   ;;  %v712_v10 = vld [vmem:[%s2698_s4 + $0x98] sm:$0xff]  ;;  %v713_v11 = vld [vmem:[%s2698_s4 + $0xa0] sm:$0xff]  ;;  %v714_v12 = vld [vmem:[%s2698_s4 + $0xa8] sm:$0xff] }
  0x44   :  { %v715_v13 = vld [vmem:[%s2698_s4 + $0xb0] sm:$0xff]  ;;  %v716_v14 = vld [vmem:[%s2698_s4 + $0xb8] sm:$0xff]  ;;  %v717_v15 = vld [vmem:[%s2698_s4 + $0xc0] sm:$0xff]  ;;  %p1903_p4 = pnand %p1902_p3, %p1896_p0 }
  0x45   :  { %v718_v16 = vld [vmem:[%s2698_s4 + $0xc8] sm:$0xff]  ;;  %v719_v17 = vld [vmem:[%s2698_s4 + $0xd0] sm:$0xff]  ;;  %v720_v18 = vld [vmem:[%s2698_s4 + $0xd8] sm:$0xff] }
  0x46   :  { %1808 = vmatmul.mubr.msk.bf16.gmra.mrb[28].mxu0 %vm339_vm0, %v1846_v56  ;;  %737 = vperm.xlu0 %1829, %v695_v57   ;;  %v1302_v19 = vld [vmem:[%s2699_s5] sm:$0xff]  ;;  %v1303_v20 = vld [vmem:[%s2699_s5 + $0x8] sm:$0xff]  ;;  %v1304_v21 = vld [vmem:[%s2699_s5 + $0x10] sm:$0xff] }
  0x47   :  { %742 = vperm.xlu1 %1830, %v696_v58   ;;  %v1305_v22 = vld [vmem:[%s2699_s5 + $0x18] sm:$0xff]  ;;  %v1306_v23 = vld [vmem:[%s2699_s5 + $0x20] sm:$0xff]  ;;  %v1307_v24 = vld [vmem:[%s2699_s5 + $0x28] sm:$0xff] }
  0x48   :  { %v1308_v25 = vld [vmem:[%s2699_s5 + $0x30] sm:$0xff]  ;;  %v1309_v26 = vld [vmem:[%s2699_s5 + $0x38] sm:$0xff]  ;;  %v1310_v27 = vld [vmem:[%s2699_s5 + $0x40] sm:$0xff] }
  0x49   :  { %v1311_v28 = vld [vmem:[%s2699_s5 + $0x48] sm:$0xff]  ;;  %v1312_v29 = vld [vmem:[%s2699_s5 + $0x50] sm:$0xff]  ;;  %v1313_v30 = vld [vmem:[%s2699_s5 + $0x58] sm:$0xff] }
  0x4a   :  { %747 = vperm.xlu0 %1829, %v697_v59   ;;  %v1314_v31 = vld [vmem:[%s2699_s5 + $0x60] sm:$0xff]  ;;  %v1315_v32 = vld [vmem:[%s2699_s5 + $0x68] sm:$0xff]  ;;  %v1316_v33 = vld [vmem:[%s2699_s5 + $0x70] sm:$0xff] }
  0x4b   :  { %752 = vperm.xlu1 %1830, %v698_v60   ;;  %v1317_v34 = vld [vmem:[%s2699_s5 + $0x78] sm:$0xff]  ;;  %v1318_v35 = vld [vmem:[%s2699_s5 + $0x80] sm:$0xff]  ;;  %v1319_v36 = vld [vmem:[%s2699_s5 + $0x88] sm:$0xff] }
  0x4c   :  { %v1320_v37 = vld [vmem:[%s2699_s5 + $0x90] sm:$0xff]  ;;  %v1321_v38 = vld [vmem:[%s2699_s5 + $0x98] sm:$0xff]  ;;  %v1322_v41 = vld [vmem:[%s2699_s5 + $0xa0] sm:$0xff] }
  0x4d   :  { %v1323_v42 = vld [vmem:[%s2699_s5 + $0xa8] sm:$0xff]  ;;  %v1324_v44 = vld [vmem:[%s2699_s5 + $0xb0] sm:$0xff]  ;;  %v1325_v45 = vld [vmem:[%s2699_s5 + $0xb8] sm:$0xff] }
  0x4e   :  { %757 = vperm.xlu0 %1829, %v699_v61   ;;  %v1326_v47 = vld [vmem:[%s2699_s5 + $0xc0] sm:$0xff]  ;;  %v1327_v48 = vld [vmem:[%s2699_s5 + $0xc8] sm:$0xff]  ;;  %v1852_v50 = vld [vmem:[%s2697_s3 + $0x54] ss:$8 sps:$4 sm:$0xff]  }
  0x4f   :  { %762 = vperm.xlu1 %1830, %v700_v62   ;;  %v1849_v49 = vld [vmem:[%s2697_s3 + $0x4] ss:$8 sps:$4 sm:$0xff]   ;;  %v1328_v54 = vld [vmem:[%s2699_s5 + $0xd0] sm:$0xff]  ;;  %1117 = vmatprep.mubr.bf16.mxu1 %v1852_v50  ;;  %v1329_v57 = vld [vmem:[%s2699_s5 + $0xd8] sm:$0xff] }
  0x50   :  { %1077 = vmatprep.mubr.bf16.mxu0 %v1849_v49  ;;  %v721_v53 = vld [vmem:[%s2698_s4 + $0xe0] sm:$0xff]  ;;  %v722_v56 = vld [vmem:[%s2698_s4 + $0xe8] sm:$0xff]  ;;  %v723_v59 = vld [vmem:[%s2698_s4 + $0xf0] sm:$0xff] }
  0x51   :  { %v1330_v60 = vld [vmem:[%s2699_s5 + $0xe0] sm:$0xff] }
  0x52   :  { %767 = vperm.xlu0 %1829, %v701_v63   ;;  %v724_v63 = vld [vmem:[%s2698_s4 + $0xf8] sm:$0xff] }
  0x53   :  { %772 = vperm.xlu1 %1830, %v702_v0   ;;  %v1331_v0 = vld [vmem:[%s2699_s5 + $0xe8] sm:$0xff] }
  0x56   :  { %777 = vperm.xlu0 %1829, %v703_v1  }
  0x57   :  { %782 = vperm.xlu1 %1830, %v704_v2   ;;  %v1332_v2 = vld [vmem:[%s2699_s5 + $0xf0] sm:$0xff] }
  0x5a   :  { %787 = vperm.xlu0 %1829, %v705_v3   ;;  %v1333_v3 = vld [vmem:[%s2699_s5 + $0xf8] sm:$0xff] }
  0x5b   :  { %792 = vperm.xlu1 %1830, %v706_v4  }
  0x5e   :  { %797 = vperm.xlu0 %1829, %v707_v5  }
  0x5f   :  { %802 = vperm.xlu1 %1830, %v708_v6  }
  0x62   :  { %807 = vperm.xlu0 %1829, %v709_v7  }
  0x63   :  { %812 = vperm.xlu1 %1830, %v710_v8  }
  0x66   :  { %817 = vperm.xlu0 %1829, %v711_v9  }
  0x67   :  { %822 = vperm.xlu1 %1830, %v712_v10  }
  0x6a   :  { %827 = vperm.xlu0 %1829, %v713_v11  }
  0x6b   :  { %832 = vperm.xlu1 %1830, %v714_v12  }
  0x6e   :  { %837 = vperm.xlu0 %1829, %v715_v13  }
  0x6f   :  { %842 = vperm.xlu1 %1830, %v716_v14  }
  0x72   :  { %847 = vperm.xlu0 %1829, %v717_v15  }
  0x73   :  { %852 = vperm.xlu1 %1830, %v718_v16  }
  0x76   :  { %857 = vperm.xlu0 %1829, %v719_v17  }
  0x77   :  { %862 = vperm.xlu1 %1830, %v720_v18  }
  0x7a   :  { %1336 = vperm.xlu0 %1829, %v1302_v19  }
  0x7b   :  { %1341 = vperm.xlu1 %1830, %v1303_v20  }
  0x7e   :  { %1346 = vperm.xlu0 %1829, %v1304_v21  }
  0x7f   :  { %1351 = vperm.xlu1 %1830, %v1305_v22  }
  0x81   :  { %v2277_v39 = vpop.permute.xlu0 %181 }
  0x82   :  { %1356 = vperm.xlu0 %1829, %v1306_v23   ;;  %v102_v40 = vpop.permute.xlu1 %101 }
  0x83   :  { %1361 = vperm.xlu1 %1830, %v1307_v24  }
  0x85   :  { %v2285_v43 = vpop.permute.xlu0 %186 }
  0x86   :  { %1366 = vperm.xlu0 %1829, %v1308_v25   ;;  %v107_v46 = vpop.permute.xlu1 %106 }
  0x87   :  { %1371 = vperm.xlu1 %1830, %v1309_v26  }
  0x89   :  { %v2305_v51 = vpop.permute.xlu0 %191 }
  0x8a   :  { %1376 = vperm.xlu0 %1829, %v1310_v27   ;;  %v2307_v52 = vpop.permute.xlu1 %196 }
  0x8b   :  { %1381 = vperm.xlu1 %1830, %v1311_v28  }
  0x8d   :  { %v112_v55 = vpop.permute.xlu0 %111 }
  0x8e   :  { %1386 = vperm.xlu0 %1829, %v1312_v29   ;;  %v117_v58 = vpop.permute.xlu1 %116 }
  0x8f   :  { %1391 = vperm.xlu1 %1830, %v1313_v30  }
  0x91   :  { %v2327_v61 = vpop.permute.xlu0 %201 }
  0x92   :  { %1396 = vperm.xlu0 %1829, %v1314_v31   ;;  %v2329_v62 = vpop.permute.xlu1 %206 }
  0x93   :  { %1401 = vperm.xlu1 %1830, %v1315_v32  }
  0x95   :  { %v122_v1 = vpop.permute.xlu0 %121 }
  0x96   :  { %1406 = vperm.xlu0 %1829, %v1316_v33   ;;  %v127_v4 = vpop.permute.xlu1 %126 }
  0x97   :  { %1411 = vperm.xlu1 %1830, %v1317_v34  }
  0x99   :  { %v2343_v5 = vpop.permute.xlu0 %211 }
  0x9a   :  { %1416 = vperm.xlu0 %1829, %v1318_v35   ;;  %v2345_v6 = vpop.permute.xlu1 %216 }
  0x9b   :  { %1421 = vperm.xlu1 %1830, %v1319_v36  }
  0x9d   :  { %v132_v7 = vpop.permute.xlu0 %131 }
  0x9e   :  { %1426 = vperm.xlu0 %1829, %v1320_v37   ;;  %v137_v8 = vpop.permute.xlu1 %136 }
  0x9f   :  { %1431 = vperm.xlu1 %1830, %v1321_v38  }
  0xa1   :  { %v2347_v9 = vpop.permute.xlu0 %221 }
  0xa2   :  { %1436 = vperm.xlu0 %1829, %v1322_v41   ;;  %v2349_v10 = vpop.permute.xlu1 %226 }
  0xa3   :  { %1441 = vperm.xlu1 %1830, %v1323_v42  }
  0xa5   :  { %v142_v11 = vpop.permute.xlu0 %141 }
  0xa6   :  { %1446 = vperm.xlu0 %1829, %v1324_v44   ;;  %v2351_v12 = vpop.permute.xlu1 %146 }
  0xa7   :  { %1451 = vperm.xlu1 %1830, %v1325_v45  }
  0xa9   :  { %v2353_v13 = vpop.permute.xlu0 %231 }
  0xaa   :  { %1456 = vperm.xlu0 %1829, %v1326_v47   ;;  %v2355_v14 = vpop.permute.xlu1 %236 }
  0xab   :  { %1461 = vperm.xlu1 %1830, %v1327_v48  }
  0xad   :  { %v152_v15 = vpop.permute.xlu0 %151 }
  0xae   :  { %867 = vperm.xlu0 %1829, %v721_v53   ;;  %v157_v19 = vpop.permute.xlu1 %156 }
  0xaf   :  { %1466 = vperm.xlu1 %1830, %v1328_v54  }
  0xb1   :  { %v2357_v28 = vpop.permute.xlu0 %241 }
  0xb2   :  { %872 = vperm.xlu0 %1829, %v722_v56   ;;  %v2359_v32 = vpop.permute.xlu1 %246 }
  0xb3   :  { %1471 = vperm.xlu1 %1830, %v1329_v57  }
  0xb5   :  { %v162_v47 = vpop.permute.xlu0 %161 }
  0xb6   :  { %877 = vperm.xlu0 %1829, %v723_v59   ;;  %v167_v53 = vpop.permute.xlu1 %166 }
  0xb7   :  { %1476 = vperm.xlu1 %1830, %v1330_v60  }
  0xba   :  { %882 = vperm.xlu0 %1829, %v724_v63  }
  0xbb   :  { %1481 = vperm.xlu1 %1830, %v1331_v0  }
  0xbe   :  { %1486 = vperm.xlu0 %1829, %v1332_v2   ;;  %v2369_v2 = vpop.permute.xlu0 %251 }
  0xbf   :  { %1491 = vperm.xlu1 %1830, %v1333_v3  }
  0xe1   :  { %v1781_v16 = vpop.f32.mrb[0].mxu0 }
  0xe2   :  { %v431_v17 = vadd.f32 %v1781_v16, %v112_v55  ;;  %v422_v18 = vpop.f32.mrb[1].mxu0 }
  0xe3   :  { %v423_v20 = vadd.f32 %v422_v18, %v102_v40  ;;  %v1782_v21 = vpop.f32.mrb[2].mxu0 }
  0xe4   :  { %v583_v22 = vmul.f32 0.2, %v431_v17  ;;  %v434_v23 = vadd.f32 %v1782_v21, %v117_v58  ;;  %v425_v24 = vpop.f32.mrb[3].mxu0  ;;  %vm551_vm1 = vcmp.gt.f32.partialorder %v431_v17, 0.0 }
  0xe5   :  { %v581_v25 = vmul.f32 0.2, %v423_v20  ;;  %v426_v26 = vadd.f32 %v425_v24, %v107_v46  ;;  %vm549_vm2 = vcmp.gt.f32.partialorder %v423_v20, 0.0  ;;  %v172_v24 = vpop.permute.xlu0 %171 }
  0xe6   :  { %vm552_vm3 = vcmp.gt.f32.partialorder %v434_v23, 0.0  ;;  %v584_v27 = vmul.f32 0.2, %v434_v23  ;;  %v615_v30 = vsel %vm551_vm1, %v431_v17, %v583_v22  ;;  %v2371_v17 = vpop.permute.xlu1 %256 }
  0xe7   :  { %vm550_vm4 = vcmp.gt.f32.partialorder %v426_v26, 0.0  ;;  %v582_v29 = vmul.f32 0.2, %v426_v26  ;;  %v613_v33 = vsel %vm549_vm2, %v423_v20, %v581_v25 }
  0xe8   :  { %v616_v31 = vsel %vm552_vm3, %v434_v23, %v584_v27 }
  0xe9   :  { %v2361_v34 = vpack.c.bf16 %v616_v31, %v615_v30  ;;  %v614_v35 = vsel %vm550_vm4, %v426_v26, %v582_v29  ;;  %v1785_v36 = vpop.f32.mrb[4].mxu0 }
  0xea   :  { %v2363_v37 = vpack.c.bf16 %v614_v35, %v613_v33  ;;  %v447_v38 = vadd.f32 %v1785_v36, %v132_v7  ;;  %v438_v40 = vpop.f32.mrb[5].mxu0  ;;  %v177_v31 = vpop.permute.xlu1 %176 }
  0xeb   :  { %v439_v41 = vadd.f32 %v438_v40, %v122_v1  ;;  %v1786_v42 = vpop.f32.mrb[6].mxu0 }
  0xec   :  { %v587_v44 = vmul.f32 0.2, %v447_v38  ;;  %v450_v45 = vadd.f32 %v1786_v42, %v137_v8  ;;  %v441_v46 = vpop.f32.mrb[7].mxu0  ;;  %vm555_vm5 = vcmp.gt.f32.partialorder %v447_v38, 0.0 }
  0xed   :  { %v585_v48 = vmul.f32 0.2, %v439_v41  ;;  %v442_v49 = vadd.f32 %v441_v46, %v127_v4  ;;  %vm553_vm6 = vcmp.gt.f32.partialorder %v439_v41, 0.0 }
  0xee   :  { %vm556_vm7 = vcmp.gt.f32.partialorder %v450_v45, 0.0  ;;  %v588_v50 = vmul.f32 0.2, %v450_v45  ;;  %v619_v55 = vsel %vm555_vm5, %v447_v38, %v587_v44 }
  0xef   :  { %vm554_vm8 = vcmp.gt.f32.partialorder %v442_v49, 0.0  ;;  %v586_v54 = vmul.f32 0.2, %v442_v49  ;;  %v617_v57 = vsel %vm553_vm6, %v439_v41, %v585_v48 }
  0xf0   :  { %v620_v56 = vsel %vm556_vm7, %v450_v45, %v588_v50 }
  0xf1   :  { %v2365_v58 = vpack.c.bf16 %v620_v56, %v619_v55  ;;  %v618_v59 = vsel %vm554_vm8, %v442_v49, %v586_v54  ;;  %v1789_v60 = vpop.f32.mrb[8].mxu0 }
  0xf2   :  { %v2367_v63 = vpack.c.bf16 %v618_v59, %v617_v57  ;;  %v463_v0 = vadd.f32 %v1789_v60, %v152_v15  ;;  %v454_v1 = vpop.f32.mrb[9].mxu0 }
  0xf3   :  { %v455_v3 = vadd.f32 %v454_v1, %v142_v11  ;;  %v1790_v4 = vpop.f32.mrb[10].mxu0 }
  0xf4   :  { %v591_v7 = vmul.f32 0.2, %v463_v0  ;;  %v466_v8 = vadd.f32 %v1790_v4, %v157_v19  ;;  %v457_v16 = vpop.f32.mrb[11].mxu0  ;;  %vm559_vm9 = vcmp.gt.f32.partialorder %v463_v0, 0.0 }
  0xf5   :  { %v589_v18 = vmul.f32 0.2, %v455_v3  ;;  %v458_v20 = vadd.f32 %v457_v16, %v2351_v12  ;;  %vm557_vm10 = vcmp.gt.f32.partialorder %v455_v3, 0.0 }
  0xf6   :  { %vm560_vm11 = vcmp.gt.f32.partialorder %v466_v8, 0.0  ;;  %v592_v21 = vmul.f32 0.2, %v466_v8  ;;  %v623_v15 = vsel %vm559_vm9, %v463_v0, %v591_v7 }
  0xf7   :  { %vm558_vm12 = vcmp.gt.f32.partialorder %v458_v20, 0.0  ;;  %v590_v22 = vmul.f32 0.2, %v458_v20  ;;  %v621_v25 = vsel %vm557_vm10, %v455_v3, %v589_v18 }
  0xf8   :  { %v624_v23 = vsel %vm560_vm11, %v466_v8, %v592_v21 }
  0xf9   :  { %v2374_v11 = vpack.c.bf16 %v624_v23, %v623_v15  ;;  %v622_v26 = vsel %vm558_vm12, %v458_v20, %v590_v22  ;;  %v1793_v19 = vpop.f32.mrb[12].mxu0 }
  0xfa   :  { %v2376_v27 = vpack.c.bf16 %v622_v26, %v621_v25  ;;  %v479_v29 = vadd.f32 %v1793_v19, %v172_v24  ;;  %v470_v30 = vpop.f32.mrb[13].mxu0 }
  0xfb   :  { %v471_v33 = vadd.f32 %v470_v30, %v162_v47  ;;  %v1794_v12 = vpop.f32.mrb[14].mxu0 }
  0xfc   :  { %v595_v35 = vmul.f32 0.2, %v479_v29  ;;  %v482_v36 = vadd.f32 %v1794_v12, %v177_v31  ;;  %v473_v38 = vpop.f32.mrb[15].mxu0  ;;  %vm563_vm13 = vcmp.gt.f32.partialorder %v479_v29, 0.0 }
  0xfd   :  { %v593_v40 = vmul.f32 0.2, %v471_v33  ;;  %v474_v41 = vadd.f32 %v473_v38, %v167_v53  ;;  %vm561_vm14 = vcmp.gt.f32.partialorder %v471_v33, 0.0 }
  0xfe   :  { %vm564_vm15 = vcmp.gt.f32.partialorder %v482_v36, 0.0  ;;  %v596_v42 = vmul.f32 0.2, %v482_v36  ;;  %v627_v45 = vsel %vm563_vm13, %v479_v29, %v595_v35 }
  0xff   :  { %vm562_vm0 = vcmp.gt.f32.partialorder %v474_v41, 0.0  ;;  %v594_v44 = vmul.f32 0.2, %v474_v41  ;;  %v625_v48 = vsel %vm561_vm14, %v471_v33, %v593_v40 }
 0x100   :  { %v628_v46 = vsel %vm564_vm15, %v482_v36, %v596_v42 }
 0x101   :  { %v2378_v49 = vpack.c.bf16 %v628_v46, %v627_v45  ;;  %v626_v50 = vsel %vm562_vm0, %v474_v41, %v594_v44  ;;  %v1797_v54 = vpop.f32.mrb[16].mxu0 }
 0x102   :  { %v2380_v47 = vpack.c.bf16 %v626_v50, %v625_v48  ;;  %v495_v55 = vadd.f32 %v1797_v54, %v2305_v51  ;;  %v486_v56 = vpop.f32.mrb[17].mxu0 }
 0x103   :  { %v487_v57 = vadd.f32 %v486_v56, %v2277_v39  ;;  %v1798_v53 = vpop.f32.mrb[18].mxu0 }
 0x104   :  { %v599_v59 = vmul.f32 0.2, %v495_v55  ;;  %v498_v60 = vadd.f32 %v1798_v53, %v2307_v52  ;;  %v489_v0 = vpop.f32.mrb[19].mxu0  ;;  %vm567_vm1 = vcmp.gt.f32.partialorder %v495_v55, 0.0 }
 0x105   :  { %v597_v1 = vmul.f32 0.2, %v487_v57  ;;  %v490_v3 = vadd.f32 %v489_v0, %v2285_v43  ;;  %vm565_vm2 = vcmp.gt.f32.partialorder %v487_v57, 0.0 }
 0x106   :  { %vm568_vm3 = vcmp.gt.f32.partialorder %v498_v60, 0.0  ;;  %v600_v4 = vmul.f32 0.2, %v498_v60  ;;  %v631_v8 = vsel %vm567_vm1, %v495_v55, %v599_v59 }
 0x107   :  { %vm566_vm4 = vcmp.gt.f32.partialorder %v490_v3, 0.0  ;;  %v598_v7 = vmul.f32 0.2, %v490_v3  ;;  %v629_v18 = vsel %vm565_vm2, %v487_v57, %v597_v1 }
 0x108   :  { %v632_v16 = vsel %vm568_vm3, %v498_v60, %v600_v4 }
 0x109   :  { %v1801_v51 = vpop.f32.mrb[20].mxu0  ;;  %v630_v20 = vsel %vm566_vm4, %v490_v3, %v598_v7  ;;  %v686_v39 = vpack.c.bf16 %v632_v16, %v631_v8  ;;  %v1853_v8 = vld [vmem:[%s2697_s3 + $0x14] ss:$8 sps:$4 sm:$0xff]   ;;  %v1857_v16 = vld [vmem:[%s2697_s3 + $0x10] ss:$8 sps:$4 sm:$0xff]  }
 0x10a   :  { %v511_v21 = vadd.f32 %v1801_v51, %v2343_v5  ;;  %v502_v22 = vpop.f32.mrb[21].mxu0  ;;  %v685_v52 = vpack.c.bf16 %v630_v20, %v629_v18  ;;  %v1859_v51 = vld [vmem:[%s2697_s3 + $0x24] ss:$8 sps:$4 sm:$0xff]   ;;  %v1861_v18 = vld [vmem:[%s2697_s3 + $0x74] ss:$8 sps:$4 sm:$0xff]  }
 0x10b   :  { %v503_v15 = vadd.f32 %v502_v22, %v2327_v61  ;;  %v1802_v23 = vpop.f32.mrb[22].mxu0  ;;  %v1863_v20 = vld [vmem:[%s2697_s3 + $0x20] ss:$8 sps:$4 sm:$0xff]   ;;  %v1867_v22 = vld [vmem:[%s2697_s3 + $0x84] ss:$8 sps:$4 sm:$0xff]  }
 0x10c   :  { %v603_v24 = vmul.f32 0.2, %v511_v21  ;;  %v514_v43 = vadd.f32 %v1802_v23, %v2345_v6  ;;  %v505_v25 = vpop.f32.mrb[23].mxu0  ;;  %1663 = vmatprep.subr.bf16.mxu0 %v685_v52  ;;  %1811 = vmatprep.subr.bf16.mxu1 %v685_v52  ;;  %vm571_vm5 = vcmp.gt.f32.partialorder %v511_v21, 0.0  ;;  %v1869_v52 = vld [vmem:[%s2697_s3 + $0x30] ss:$8 sps:$4 sm:$0xff]  }
 0x10d   :  { %v601_v26 = vmul.f32 0.2, %v503_v15  ;;  %v506_v19 = vadd.f32 %v505_v25, %v2329_v62  ;;  %1664 = vmatpush3.bf16.msra.mxu0 %v2363_v37  ;;  %1819 = vmatpush3.bf16.msra.mxu1 %v2363_v37  ;;  %vm569_vm6 = vcmp.gt.f32.partialorder %v503_v15, 0.0  ;;  %v1871_v23 = vld [vmem:[%s2697_s3 + $0x44] ss:$8 sps:$4 sm:$0xff]  }
 0x10e   :  { %vm572_vm7 = vcmp.gt.f32.partialorder %v514_v43, 0.0  ;;  %v604_v5 = vmul.f32 0.2, %v514_v43  ;;  %1665 = vmatprep.subr.bf16.mxu0 %v686_v39  ;;  %1812 = vmatprep.subr.bf16.mxu1 %v686_v39  ;;  %v635_v29 = vsel %vm571_vm5, %v511_v21, %v603_v24  ;;  %v1864_v39 = vld [vmem:[%s2697_s3 + $0x70] ss:$8 sps:$4 sm:$0xff]  }
 0x10f   :  { %vm570_vm8 = vcmp.gt.f32.partialorder %v506_v19, 0.0  ;;  %v602_v61 = vmul.f32 0.2, %v506_v19  ;;  %v633_v31 = vsel %vm569_vm6, %v503_v15, %v601_v26  ;;  %v1865_v21 = vld [vmem:[%s2697_s3 + $0x34] ss:$8 sps:$4 sm:$0xff]  }
 0x110   :  { %v636_v6 = vsel %vm572_vm7, %v514_v43, %v604_v5  ;;  %v1870_v15 = vld [vmem:[%s2697_s3 + $0x80] ss:$8 sps:$4 sm:$0xff]   ;;  %v1873_v24 = vld [vmem:[%s2697_s3 + $0x94] ss:$8 sps:$4 sm:$0xff]   ;;  %v1876_v25 = vld [vmem:[%s2697_s3 + $0x90] ss:$8 sps:$4 sm:$0xff]  }
 0x111   :  { %v1805_v30 = vpop.f32.mrb[24].mxu0  ;;  %1666 = vmatpush3.bf16.msra.mxu0 %v2361_v34  ;;  %1820 = vmatpush3.bf16.msra.mxu1 %v2361_v34  ;;  %v634_v62 = vsel %vm570_vm8, %v506_v19, %v602_v61  ;;  %v688_v33 = vpack.c.bf16 %v636_v6, %v635_v29  ;;  %v1875_v43 = vld [vmem:[%s2697_s3 + $0x40] ss:$8 sps:$4 sm:$0xff]   ;;  %v1877_v26 = vld [vmem:[%s2697_s3 + $0xa4] ss:$8 sps:$4 sm:$0xff]  }
 0x112   :  { %v527_v12 = vadd.f32 %v1805_v30, %v2353_v13  ;;  %v518_v37 = vpop.f32.mrb[25].mxu0  ;;  %v687_v35 = vpack.c.bf16 %v634_v62, %v633_v31  ;;  %v1879_v19 = vld [vmem:[%s2697_s3 + $0xa0] ss:$8 sps:$4 sm:$0xff]   ;;  %v1880_v5 = vld [vmem:[%s2697_s3 + $0xb4] ss:$8 sps:$4 sm:$0xff]  }
 0x113   :  { %v519_v36 = vadd.f32 %v518_v37, %v2347_v9  ;;  %v1806_v38 = vpop.f32.mrb[26].mxu0  ;;  %v1882_v61 = vld [vmem:[%s2697_s3 + $0xb0] ss:$8 sps:$4 sm:$0xff]   ;;  %v1883_v29 = vld [vmem:[%s2697_s3 + $0xc4] ss:$8 sps:$4 sm:$0xff]  }
 0x114   :  { %v607_v40 = vmul.f32 0.2, %v527_v12  ;;  %v530_v41 = vadd.f32 %v1806_v38, %v2355_v14  ;;  %v521_v42 = vpop.f32.mrb[27].mxu0  ;;  %1667 = vmatprep.subr.bf16.mxu0 %v687_v35  ;;  %1813 = vmatprep.subr.bf16.mxu1 %v687_v35  ;;  %vm575_vm9 = vcmp.gt.f32.partialorder %v527_v12, 0.0  ;;  %v1885_v6 = vld [vmem:[%s2697_s3 + $0xc0] ss:$8 sps:$4 sm:$0xff]   ;;  %v728_v35 = vpop.permute.xlu0 %727 }
 0x115   :  { %v605_v44 = vmul.f32 0.2, %v519_v36  ;;  %v522_v34 = vadd.f32 %v521_v42, %v2349_v10  ;;  %1668 = vmatpush3.bf16.msra.mxu0 %v2367_v63  ;;  %1821 = vmatpush3.bf16.msra.mxu1 %v2367_v63  ;;  %vm573_vm10 = vcmp.gt.f32.partialorder %v519_v36, 0.0  ;;  %v1886_v30 = vld [vmem:[%s2697_s3 + $0xd4] ss:$8 sps:$4 sm:$0xff]  }
 0x116   :  { %vm576_vm11 = vcmp.gt.f32.partialorder %v530_v41, 0.0  ;;  %v608_v13 = vmul.f32 0.2, %v530_v41  ;;  %1669 = vmatprep.subr.bf16.mxu0 %v688_v33  ;;  %1814 = vmatprep.subr.bf16.mxu1 %v688_v33  ;;  %v639_v45 = vsel %vm575_vm9, %v527_v12, %v607_v40  ;;  %v1888_v31 = vld [vmem:[%s2697_s3 + $0xd0] ss:$8 sps:$4 sm:$0xff]  }
 0x117   :  { %vm574_vm12 = vcmp.gt.f32.partialorder %v522_v34, 0.0  ;;  %v606_v9 = vmul.f32 0.2, %v522_v34  ;;  %v637_v48 = vsel %vm573_vm10, %v519_v36, %v605_v44  ;;  %v1889_v62 = vld [vmem:[%s2697_s3 + $0xe4] ss:$8 sps:$4 sm:$0xff]   ;;  %v733_v36 = vpop.permute.xlu1 %732 }
 0x118   :  { %v640_v14 = vsel %vm576_vm11, %v530_v41, %v608_v13  ;;  %v1891_v33 = vld [vmem:[%s2697_s3 + $0xe0] ss:$8 sps:$4 sm:$0xff]   ;;  %v1892_v12 = vld [vmem:[%s2697_s3 + $0xf4] ss:$8 sps:$4 sm:$0xff]   ;;  %v1894_v37 = vld [vmem:[%s2697_s3 + $0xf0] ss:$8 sps:$4 sm:$0xff]   ;;  %v2504_v38 = vpop.permute.xlu0 %737 }
 0x119   :  { %v1809_v46 = vpop.f32.mrb[28].mxu0  ;;  %1670 = vmatpush3.bf16.msra.mxu0 %v2365_v58  ;;  %1822 = vmatpush3.bf16.msra.mxu1 %v2365_v58  ;;  %v638_v10 = vsel %vm574_vm12, %v522_v34, %v606_v9  ;;  %v690_v50 = vpack.c.bf16 %v640_v14, %v639_v45 }
 0x11a   :  { %v543_v54 = vadd.f32 %v1809_v46, %v2369_v2  ;;  %v534_v63 = vpop.f32.mrb[29].mxu0  ;;  %v689_v55 = vpack.c.bf16 %v638_v10, %v637_v48 }
 0x11b   :  { %v535_v56 = vadd.f32 %v534_v63, %v2357_v28  ;;  %v1810_v57 = vpop.f32.mrb[30].mxu0  ;;  %v2506_v40 = vpop.permute.xlu1 %742 }
 0x11c   :  { %v611_v53 = vmul.f32 0.2, %v543_v54  ;;  %v546_v59 = vadd.f32 %v1810_v57, %v2371_v17  ;;  %v537_v60 = vpop.f32.mrb[31].mxu0  ;;  %1671 = vmatprep.subr.bf16.mxu0 %v689_v55  ;;  %1815 = vmatprep.subr.bf16.mxu1 %v689_v55  ;;  %vm579_vm13 = vcmp.gt.f32.partialorder %v543_v54, 0.0  ;;  %v2508_v41 = vpop.permute.xlu0 %747 }
 0x11d   :  { %v609_v0 = vmul.f32 0.2, %v535_v56  ;;  %v538_v58 = vadd.f32 %v537_v60, %v2359_v32  ;;  %1672 = vmatpush3.bf16.msra.mxu0 %v2376_v27  ;;  %1823 = vmatpush3.bf16.msra.mxu1 %v2376_v27  ;;  %vm577_vm14 = vcmp.gt.f32.partialorder %v535_v56, 0.0  ;;  %v1847_v27 = vld [vmem:[%s2697_s3] ss:$8 sps:$4 sm:$0xff]  }
 0x11e   :  { %vm580_vm15 = vcmp.gt.f32.partialorder %v546_v59, 0.0  ;;  %v612_v2 = vmul.f32 0.2, %v546_v59  ;;  %1673 = vmatprep.subr.bf16.mxu0 %v690_v50  ;;  %1816 = vmatprep.subr.bf16.mxu1 %v690_v50  ;;  %v643_v1 = vsel %vm579_vm13, %v543_v54, %v611_v53 }
 0x11f   :  { %vm578_vm0 = vcmp.gt.f32.partialorder %v538_v58, 0.0  ;;  %v610_v28 = vmul.f32 0.2, %v538_v58  ;;  %v641_v3 = vsel %vm577_vm14, %v535_v56, %v609_v0  ;;  %v2510_v42 = vpop.permute.xlu1 %752 }
 0x120   :  { %v644_v17 = vsel %vm580_vm15, %v546_v59, %v612_v2  ;;  %v2512_v44 = vpop.permute.xlu0 %757 }
 0x121   :  { %1674 = vmatpush3.bf16.msra.mxu0 %v2374_v11  ;;  %1824 = vmatpush3.bf16.msra.mxu1 %v2374_v11  ;;  %v642_v4 = vsel %vm578_vm0, %v538_v58, %v610_v28  ;;  %v692_v32 = vpack.c.bf16 %v644_v17, %v643_v1  ;;  %v1850_v11 = vld [vmem:[%s2697_s3 + $0x50] ss:$8 sps:$4 sm:$0xff]  }
 0x122   :  { %v691_v7 = vpack.c.bf16 %v642_v4, %v641_v3 }
 0x123   :  { %v2514_v34 = vpop.permute.xlu1 %762 }
 0x124   :  { %1675 = vmatprep.subr.bf16.mxu0 %v691_v7  ;;  %1817 = vmatprep.subr.bf16.mxu1 %v691_v7  ;;  %v2516_v13 = vpop.permute.xlu0 %767 }
 0x125   :  { %1676 = vmatpush3.bf16.msra.mxu0 %v2380_v47  ;;  %1825 = vmatpush3.bf16.msra.mxu1 %v2380_v47  ;;  %v1855_v47 = vld [vmem:[%s2697_s3 + $0x64] ss:$8 sps:$4 sm:$0xff]  }
 0x126   :  { %1677 = vmatprep.subr.bf16.mxu0 %v692_v32  ;;  %1818 = vmatprep.subr.bf16.mxu1 %v692_v32 }
 0x127   :  { %v2518_v9 = vpop.permute.xlu1 %772 }
 0x128   :  { %v2520_v45 = vpop.permute.xlu0 %777 }
 0x129   :  { %1678 = vmatpush3.bf16.msra.mxu0 %v2378_v49  ;;  %1826 = vmatpush3.bf16.msra.mxu1 %v2378_v49  ;;  %v1858_v49 = vld [vmem:[%s2697_s3 + $0x60] ss:$8 sps:$4 sm:$0xff]  }
 0x12b   :  { %v2522_v14 = vpop.permute.xlu1 %782 }
 0x12c   :  { %1078 = vmatmul.mubr.bf16.vlgmr.msra.gmra.mrb[32].mxu0 %v1847_v27  ;;  %1118 = vmatmul.mubr.bf16.vlgmr.msra.gmra.mrb[0].mxu1 %v1850_v11  ;;  %v2524_v46 = vpop.permute.xlu0 %787 }
 0x12d   :  { %1085 = vmatprep.mubr.bf16.mxu0 %v1853_v8  ;;  %1125 = vmatprep.mubr.bf16.mxu1 %v1855_v47 }
 0x12f   :  { %v2526_v48 = vpop.permute.xlu1 %792 }
 0x130   :  { %v2528_v10 = vpop.permute.xlu0 %797 }
 0x133   :  { %v2530_v50 = vpop.permute.xlu1 %802 }
 0x134   :  { %1086 = vmatmul.mubr.bf16.gmra.mrb[36].mxu0 %v1857_v16  ;;  %1126 = vmatmul.mubr.bf16.gmra.mrb[4].mxu1 %v1858_v49  ;;  %v2532_v54 = vpop.permute.xlu0 %807 }
 0x135   :  { %1093 = vmatprep.mubr.bf16.mxu0 %v1859_v51  ;;  %1133 = vmatprep.mubr.bf16.mxu1 %v1861_v18 }
 0x137   :  { %v2534_v63 = vpop.permute.xlu1 %812 }
 0x138   :  { %v2536_v55 = vpop.permute.xlu0 %817 }
 0x13b   :  { %v2538_v56 = vpop.permute.xlu1 %822 }
 0x13c   :  { %1094 = vmatmul.mubr.bf16.gmra.mrb[40].mxu0 %v1863_v20  ;;  %1134 = vmatmul.mubr.bf16.gmra.mrb[8].mxu1 %v1864_v39  ;;  %v2540_v57 = vpop.permute.xlu0 %827 }
 0x13d   :  { %1101 = vmatprep.mubr.bf16.mxu0 %v1865_v21  ;;  %1141 = vmatprep.mubr.bf16.mxu1 %v1867_v22 }
 0x13f   :  { %v2542_v53 = vpop.permute.xlu1 %832 }
 0x140   :  { %v2544_v59 = vpop.permute.xlu0 %837 }
 0x143   :  { %v2546_v60 = vpop.permute.xlu1 %842 }
 0x144   :  { %1102 = vmatmul.mubr.bf16.gmra.mrb[44].mxu0 %v1869_v52  ;;  %1142 = vmatmul.mubr.bf16.gmra.mrb[12].mxu1 %v1870_v15  ;;  %v2548_v0 = vpop.permute.xlu0 %847 }
 0x145   :  { %1109 = vmatprep.mubr.bf16.mxu0 %v1871_v23  ;;  %1149 = vmatprep.mubr.bf16.mxu1 %v1873_v24 }
 0x147   :  { %v2550_v58 = vpop.permute.xlu1 %852 }
 0x148   :  { %v2552_v2 = vpop.permute.xlu0 %857 }
 0x14b   :  { %v2554_v28 = vpop.permute.xlu1 %862 }
 0x14c   :  { %1110 = vmatmul.mubr.bf16.gmra.mrb[48].mxu0 %v1875_v43  ;;  %1150 = vmatmul.mubr.bf16.gmra.mrb[16].mxu1 %v1876_v25  ;;  %v1337_v1 = vpop.permute.xlu0 %1336 }
 0x14d   :  { %1157 = vmatprep.mubr.bf16.mxu1 %v1877_v26 }
 0x14f   :  { %v1342_v17 = vpop.permute.xlu1 %1341 }
 0x150   :  { %v1347_v3 = vpop.permute.xlu0 %1346 }
 0x153   :  { %v2556_v4 = vpop.permute.xlu1 %1351 }
 0x154   :  { %1158 = vmatmul.mubr.bf16.gmra.mrb[20].mxu1 %v1879_v19  ;;  %v2558_v32 = vpop.permute.xlu0 %1356 }
 0x155   :  { %1165 = vmatprep.mubr.bf16.mxu1 %v1880_v5 }
 0x157   :  { %v2560_v7 = vpop.permute.xlu1 %1361 }
 0x158   :  { %v2562_v27 = vpop.permute.xlu0 %1366 }
 0x15b   :  { %v2564_v11 = vpop.permute.xlu1 %1371 }
 0x15c   :  { %1166 = vmatmul.mubr.bf16.gmra.mrb[24].mxu1 %v1882_v61  ;;  %v2566_v8 = vpop.permute.xlu0 %1376 }
 0x15d   :  { %1173 = vmatprep.mubr.bf16.mxu1 %v1883_v29 }
 0x15f   :  { %v2568_v47 = vpop.permute.xlu1 %1381 }
 0x160   :  { %v2574_v26 = vpop.permute.xlu0 %1386 }
 0x163   :  { %v2576_v19 = vpop.permute.xlu1 %1391 }
 0x164   :  { %1174 = vmatmul.mubr.bf16.gmra.mrb[28].mxu1 %v1885_v6 }
 0x165   :  { %1181 = vmatprep.mubr.bf16.mxu1 %v1886_v30 }
 0x16c   :  { %1182 = vmatmul.mubr.bf16.gmra.mrb[32].mxu1 %v1888_v31 }
 0x16d   :  { %1189 = vmatprep.mubr.bf16.mxu1 %v1889_v62 }
 0x174   :  { %1190 = vmatmul.mubr.bf16.gmra.mrb[36].mxu1 %v1891_v33 }
 0x175   :  { %1197 = vmatprep.mubr.bf16.mxu1 %v1892_v12 }
 0x17c   :  { %1198 = vmatmul.mubr.bf16.gmra.mrb[40].mxu1 %v1894_v37 }
 0x1ff   :  { %v1679_v16 = vpop.f32.mrb[32].mxu0  ;;  %v1709_v49 = vpop.f32.mrb[0].mxu1 }
 0x200   :  { %v1680_v51 = vpop.f32.mrb[33].mxu0  ;;  %v1710_v18 = vpop.f32.mrb[1].mxu1 }
 0x201   :  { %v1681_v20 = vadd.f32 %v1680_v51, %v1679_v16  ;;  %v2570_v39 = vadd.f32 %v1710_v18, %v1709_v49  ;;  %v1682_v21 = vpop.f32.mrb[34].mxu0  ;;  %v1712_v22 = vpop.f32.mrb[2].mxu1 }
 0x202   :  { %v1683_v52 = vpop.f32.mrb[35].mxu0  ;;  %v1713_v15 = vpop.f32.mrb[3].mxu1 }
 0x203   :  { %v1080_v23 = vadd.f32 %v1681_v20, %v728_v35  ;;  %v1684_v24 = vadd.f32 %v1683_v52, %v1682_v21  ;;  %v2572_v43 = vadd.f32 %v1713_v15, %v1712_v22 }
 0x205   :  { %vm1206_vm1 = vcmp.gt.f32.partialorder %v1080_v23, 0.0  ;;  %v1238_v25 = vmul.f32 0.2, %v1080_v23  ;;  %v1083_v5 = vadd.f32 %v1684_v24, %v733_v36  ;;  %v2585_v24 = vpop.permute.xlu1 %1401 }
 0x207   :  { %v1685_v61 = vpop.f32.mrb[36].mxu0  ;;  %v1715_v29 = vpop.f32.mrb[4].mxu1  ;;  %v1270_v6 = vsel %vm1206_vm1, %v1080_v23, %v1238_v25  ;;  %vm1207_vm2 = vcmp.gt.f32.partialorder %v1083_v5, 0.0  ;;  %v1239_v30 = vmul.f32 0.2, %v1083_v5 }
 0x208   :  { %v1686_v31 = vpop.f32.mrb[37].mxu0  ;;  %v1716_v62 = vpop.f32.mrb[5].mxu1  ;;  %v1494_v18 = vmul.f32 %v1337_v1, %v1270_v6 }
 0x209   :  { %v1687_v33 = vadd.f32 %v1686_v31, %v1685_v61  ;;  %v2578_v12 = vadd.f32 %v1716_v62, %v1715_v29  ;;  %v1688_v37 = vpop.f32.mrb[38].mxu0  ;;  %v1718_v35 = vpop.f32.mrb[6].mxu1  ;;  %v1271_v16 = vsel %vm1207_vm2, %v1083_v5, %v1239_v30 }
 0x20a   :  { %v1689_v49 = vpop.f32.mrb[39].mxu0  ;;  %v1719_v51 = vpop.f32.mrb[7].mxu1  ;;  %v1495_v20 = vmul.f32 %v1342_v17, %v1271_v16 }
 0x20b   :  { %v1088_v21 = vadd.f32 %v1687_v33, %v2504_v38  ;;  %v1690_v36 = vadd.f32 %v1689_v49, %v1688_v37  ;;  %v2581_v22 = vadd.f32 %v1719_v51, %v1718_v35  ;;  %v2583_v23 = vpop.permute.xlu0 %1396 }
 0x20c   :  { %v1526_v52 = vadd.f32 %v1495_v20, %v1494_v18 }
 0x20d   :  { %vm1208_vm3 = vcmp.gt.f32.partialorder %v1088_v21, 0.0  ;;  %v1240_v15 = vmul.f32 0.2, %v1088_v21  ;;  %v1091_v25 = vadd.f32 %v1690_v36, %v2506_v40 }
 0x20f   :  { %v1272_v61 = vsel %vm1208_vm3, %v1088_v21, %v1240_v15  ;;  %v1691_v5 = vpop.f32.mrb[40].mxu0  ;;  %v1721_v29 = vpop.f32.mrb[8].mxu1  ;;  %vm1209_vm4 = vcmp.gt.f32.partialorder %v1091_v25, 0.0  ;;  %v1241_v1 = vmul.f32 0.2, %v1091_v25 }
 0x210   :  { %v1496_v30 = vmul.f32 %v1347_v3, %v1272_v61  ;;  %v1692_v17 = vpop.f32.mrb[41].mxu0  ;;  %v1722_v38 = vpop.f32.mrb[9].mxu1 }
 0x211   :  { %v1693_v6 = vadd.f32 %v1692_v17, %v1691_v5  ;;  %v1694_v31 = vpop.f32.mrb[42].mxu0  ;;  %v1724_v62 = vpop.f32.mrb[10].mxu1  ;;  %v1273_v37 = vsel %vm1209_vm4, %v1091_v25, %v1241_v1  ;;  %v2588_v35 = vadd.f32 %v1722_v38, %v1721_v29 }
 0x212   :  { %v1527_v33 = vadd.f32 %v1526_v52, %v1496_v30  ;;  %v1695_v16 = vpop.f32.mrb[43].mxu0  ;;  %v1725_v49 = vpop.f32.mrb[11].mxu1  ;;  %v1497_v51 = vmul.f32 %v2556_v4, %v1273_v37 }
 0x213   :  { %v1096_v40 = vadd.f32 %v1693_v6, %v2508_v41  ;;  %v1696_v18 = vadd.f32 %v1695_v16, %v1694_v31  ;;  %v2592_v20 = vadd.f32 %v1725_v49, %v1724_v62  ;;  %v2595_v15 = vpop.permute.xlu0 %1406  ;;  %v2597_v52 = vpop.permute.xlu1 %1411 }
 0x214   :  { %v1528_v3 = vadd.f32 %v1527_v33, %v1497_v51 }
 0x215   :  { %vm1210_vm5 = vcmp.gt.f32.partialorder %v1096_v40, 0.0  ;;  %v1242_v21 = vmul.f32 0.2, %v1096_v40  ;;  %v1099_v36 = vadd.f32 %v1696_v18, %v2510_v42 }
 0x217   :  { %v1274_v25 = vsel %vm1210_vm5, %v1096_v40, %v1242_v21  ;;  %vm1211_vm6 = vcmp.gt.f32.partialorder %v1099_v36, 0.0  ;;  %v1243_v61 = vmul.f32 0.2, %v1099_v36  ;;  %v1697_v5 = vpop.f32.mrb[44].mxu0  ;;  %v1727_v29 = vpop.f32.mrb[12].mxu1 }
 0x218   :  { %v1498_v4 = vmul.f32 %v2558_v32, %v1274_v25  ;;  %v1698_v41 = vpop.f32.mrb[45].mxu0  ;;  %v1728_v30 = vpop.f32.mrb[13].mxu1 }
 0x219   :  { %v1275_v1 = vsel %vm1211_vm6, %v1099_v36, %v1243_v61  ;;  %v1699_v17 = vadd.f32 %v1698_v41, %v1697_v5  ;;  %v2600_v38 = vadd.f32 %v1728_v30, %v1727_v29  ;;  %v1700_v6 = vpop.f32.mrb[46].mxu0  ;;  %v1730_v31 = vpop.f32.mrb[14].mxu1  ;;  %v1120_v36 = vadd.f32 %v2570_v39, %v2520_v45 }
 0x21a   :  { %v1529_v42 = vadd.f32 %v1528_v3, %v1498_v4  ;;  %v1499_v62 = vmul.f32 %v2560_v7, %v1275_v1  ;;  %v1701_v33 = vpop.f32.mrb[47].mxu0  ;;  %v1731_v37 = vpop.f32.mrb[15].mxu1  ;;  %v1123_v45 = vadd.f32 %v2572_v43, %v2522_v14 }
 0x21b   :  { %v1104_v16 = vadd.f32 %v1699_v17, %v2512_v44  ;;  %v1702_v49 = vadd.f32 %v1701_v33, %v1700_v6  ;;  %v2604_v40 = vadd.f32 %v1731_v37, %v1730_v31  ;;  %v2606_v18 = vpop.permute.xlu0 %1416  ;;  %v2608_v21 = vpop.permute.xlu1 %1421  ;;  %v1248_v6 = vmul.f32 0.2, %v1120_v36 }
 0x21c   :  { %v1530_v51 = vadd.f32 %v1529_v42, %v1499_v62  ;;  %vm1216_vm9 = vcmp.gt.f32.partialorder %v1120_v36, 0.0  ;;  %vm1217_vm11 = vcmp.gt.f32.partialorder %v1123_v45, 0.0 }
 0x21d   :  { %vm1212_vm7 = vcmp.gt.f32.partialorder %v1104_v16, 0.0  ;;  %v1244_v32 = vmul.f32 0.2, %v1104_v16  ;;  %v1107_v3 = vadd.f32 %v1702_v49, %v2514_v34  ;;  %v1280_v14 = vsel %vm1216_vm9, %v1120_v36, %v1248_v6 }
 0x21f   :  { %v1276_v7 = vsel %vm1212_vm7, %v1104_v16, %v1244_v32  ;;  %v1703_v25 = vpop.f32.mrb[48].mxu0  ;;  %v1733_v61 = vpop.f32.mrb[16].mxu1  ;;  %vm1213_vm8 = vcmp.gt.f32.partialorder %v1107_v3, 0.0  ;;  %v1245_v5 = vmul.f32 0.2, %v1107_v3 }
 0x220   :  { %v1500_v44 = vmul.f32 %v2562_v27, %v1276_v7  ;;  %v1704_v29 = vpop.f32.mrb[49].mxu0  ;;  %v1734_v4 = vpop.f32.mrb[17].mxu1  ;;  %v1128_v27 = vadd.f32 %v2578_v12, %v2524_v46  ;;  %v1131_v46 = vadd.f32 %v2581_v22, %v2526_v48  ;;  %v1136_v12 = vadd.f32 %v2588_v35, %v2528_v10 }
 0x221   :  { %v1705_v41 = vadd.f32 %v1704_v29, %v1703_v25  ;;  %v2614_v30 = vadd.f32 %v1734_v4, %v1733_v61  ;;  %v1706_v1 = vpop.f32.mrb[50].mxu0  ;;  %v1736_v17 = vpop.f32.mrb[18].mxu1  ;;  %v1277_v34 = vsel %vm1213_vm8, %v1107_v3, %v1245_v5  ;;  %v1249_v3 = vmul.f32 0.2, %v1123_v45 }
 0x222   :  { %v1531_v39 = vadd.f32 %v1530_v51, %v1500_v44  ;;  %v1707_v31 = vpop.f32.mrb[51].mxu0  ;;  %v1737_v42 = vpop.f32.mrb[19].mxu1  ;;  %v1501_v62 = vmul.f32 %v2564_v11, %v1277_v34  ;;  %v1250_v25 = vmul.f32 0.2, %v1128_v27  ;;  %vm1218_vm13 = vcmp.gt.f32.partialorder %v1128_v27, 0.0 }
 0x223   :  { %v1112_v33 = vadd.f32 %v1705_v41, %v2516_v13  ;;  %v1708_v37 = vadd.f32 %v1707_v31, %v1706_v1  ;;  %v1738_v16 = vadd.f32 %v1737_v42, %v1736_v17  ;;  %v2622_v7 = vpop.permute.xlu0 %1426  ;;  %v2625_v51 = vpop.permute.xlu1 %1431  ;;  %v1504_v48 = vmul.f32 %v2574_v26, %v1280_v14 }
 0x224   :  { %v1532_v49 = vadd.f32 %v1531_v39, %v1501_v62  ;;  %v1281_v22 = vsel %vm1217_vm11, %v1123_v45, %v1249_v3  ;;  %v1282_v17 = vsel %vm1218_vm13, %v1128_v27, %v1250_v25  ;;  %vm1219_vm14 = vcmp.gt.f32.partialorder %v1131_v46, 0.0 }
 0x225   :  { %vm1214_vm10 = vcmp.gt.f32.partialorder %v1112_v33, 0.0  ;;  %v1246_v32 = vmul.f32 0.2, %v1112_v33  ;;  %v1115_v43 = vadd.f32 %v1708_v37, %v2518_v9  ;;  %v1139_v9 = vadd.f32 %v2592_v20, %v2530_v50 }
 0x226   :  { %v1251_v6 = vmul.f32 0.2, %v1131_v46  ;;  %v1252_v39 = vmul.f32 0.2, %v1136_v12  ;;  %vm1220_vm15 = vcmp.gt.f32.partialorder %v1136_v12, 0.0  ;;  %v1144_v20 = vadd.f32 %v2600_v38, %v2532_v54 }
 0x227   :  { %v1278_v11 = vsel %vm1214_vm10, %v1112_v33, %v1246_v32  ;;  %v1739_v13 = vpop.f32.mrb[20].mxu1  ;;  %vm1215_vm12 = vcmp.gt.f32.partialorder %v1115_v43, 0.0  ;;  %v1247_v44 = vmul.f32 0.2, %v1115_v43  ;;  %v2639_v34 = vpop.permute.xlu1 %1441  ;;  %v1253_v50 = vmul.f32 0.2, %v1139_v9 }
 0x228   :  { %v1502_v61 = vmul.f32 %v2566_v8, %v1278_v11  ;;  %v1740_v36 = vpop.f32.mrb[21].mxu1  ;;  %v2637_v8 = vpop.permute.xlu0 %1436  ;;  %vm1221_vm0 = vcmp.gt.f32.partialorder %v1139_v9, 0.0  ;;  %v1147_v26 = vadd.f32 %v2604_v40, %v2534_v63  ;;  %v1506_v27 = vmul.f32 %v2583_v23, %v1282_v17 }
 0x229   :  { %v1741_v5 = vadd.f32 %v1740_v36, %v1739_v13  ;;  %v1742_v29 = vpop.f32.mrb[22].mxu1  ;;  %v1279_v41 = vsel %vm1215_vm12, %v1115_v43, %v1247_v44  ;;  %v1283_v62 = vsel %vm1219_vm14, %v1131_v46, %v1251_v6  ;;  %v1284_v33 = vsel %vm1220_vm15, %v1136_v12, %v1252_v39 }
 0x22a   :  { %v1533_v4 = vadd.f32 %v1532_v49, %v1502_v61  ;;  %v1743_v1 = vpop.f32.mrb[23].mxu1  ;;  %v1503_v10 = vmul.f32 %v2568_v47, %v1279_v41  ;;  %v1505_v47 = vmul.f32 %v2576_v19, %v1281_v22  ;;  %v1285_v49 = vsel %vm1221_vm0, %v1139_v9, %v1253_v50 }
 0x22b   :  { %v1744_v35 = vadd.f32 %v1743_v1, %v1742_v29  ;;  %v1254_v32 = vmul.f32 0.2, %v1144_v20  ;;  %vm1222_vm1 = vcmp.gt.f32.partialorder %v1144_v20, 0.0  ;;  %v1255_v38 = vmul.f32 0.2, %v1147_v26  ;;  %v2652_v25 = vpop.permute.xlu1 %1451 }
 0x22c   :  { %v1534_v31 = vadd.f32 %v1533_v4, %v1503_v10  ;;  %v2647_v54 = vpop.permute.xlu0 %1446  ;;  %v1152_v63 = vadd.f32 %v2614_v30, %v2536_v55  ;;  %v1155_v19 = vadd.f32 %v1738_v16, %v2538_v56  ;;  %v1507_v23 = vmul.f32 %v2585_v24, %v1283_v62 }
 0x22d   :  { %vm1223_vm2 = vcmp.gt.f32.partialorder %v1147_v26, 0.0  ;;  %v1508_v13 = vmul.f32 %v2595_v15, %v1284_v33  ;;  %v1509_v12 = vmul.f32 %v2597_v52, %v1285_v49  ;;  %v1286_v61 = vsel %vm1222_vm1, %v1144_v20, %v1254_v32 }
 0x22e   :  { %v1535_v45 = vadd.f32 %v1534_v31, %v1504_v48  ;;  %v1287_v36 = vsel %vm1223_vm2, %v1147_v26, %v1255_v38  ;;  %v1256_v9 = vmul.f32 0.2, %v1152_v63  ;;  %v1257_v29 = vmul.f32 0.2, %v1155_v19 }
 0x22f   :  { %v1745_v42 = vpop.f32.mrb[24].mxu1  ;;  %v1160_v55 = vadd.f32 %v1741_v5, %v2540_v57  ;;  %vm1224_vm3 = vcmp.gt.f32.partialorder %v1152_v63, 0.0  ;;  %vm1225_vm4 = vcmp.gt.f32.partialorder %v1155_v19, 0.0  ;;  %v1163_v30 = vadd.f32 %v1744_v35, %v2542_v53  ;;  %v2661_v41 = vpop.permute.xlu1 %1461 }
 0x230   :  { %v1746_v37 = vpop.f32.mrb[25].mxu1  ;;  %v1536_v14 = vadd.f32 %v1535_v45, %v1505_v47  ;;  %v2659_v16 = vpop.permute.xlu0 %1456  ;;  %v1510_v15 = vmul.f32 %v2606_v18, %v1286_v61  ;;  %v1511_v52 = vmul.f32 %v2608_v21, %v1287_v36  ;;  %v1288_v10 = vsel %vm1224_vm3, %v1152_v63, %v1256_v9 }
 0x231   :  { %v1747_v43 = vadd.f32 %v1746_v37, %v1745_v42  ;;  %v1748_v3 = vpop.f32.mrb[26].mxu1  ;;  %v1289_v57 = vsel %vm1225_vm4, %v1155_v19, %v1257_v29  ;;  %v1258_v5 = vmul.f32 0.2, %v1160_v55  ;;  %vm1226_vm5 = vcmp.gt.f32.partialorder %v1160_v55, 0.0 }
 0x232   :  { %v1749_v40 = vpop.f32.mrb[27].mxu1  ;;  %v1537_v46 = vadd.f32 %v1536_v14, %v1506_v27  ;;  %v1259_v35 = vmul.f32 0.2, %v1163_v30  ;;  %vm1227_vm6 = vcmp.gt.f32.partialorder %v1163_v30, 0.0  ;;  %v1512_v18 = vmul.f32 %v2622_v7, %v1288_v10 }
 0x233   :  { %v1750_v11 = vadd.f32 %v1749_v40, %v1748_v3  ;;  %v1168_v17 = vadd.f32 %v1747_v43, %v2544_v59  ;;  %v1513_v31 = vmul.f32 %v2625_v51, %v1289_v57  ;;  %v1290_v26 = vsel %vm1226_vm5, %v1160_v55, %v1258_v5  ;;  %v1467_v42 = vpop.permute.xlu1 %1466 }
 0x234   :  { %v1538_v44 = vadd.f32 %v1537_v46, %v1507_v23  ;;  %v868_v21 = vpop.permute.xlu0 %867  ;;  %v1291_v27 = vsel %vm1227_vm6, %v1163_v30, %v1259_v35  ;;  %v1514_v7 = vmul.f32 %v2637_v8, %v1290_v26 }
 0x235   :  { %v1171_v50 = vadd.f32 %v1750_v11, %v2546_v60  ;;  %v1260_v47 = vmul.f32 0.2, %v1168_v17  ;;  %vm1228_vm7 = vcmp.gt.f32.partialorder %v1168_v17, 0.0  ;;  %v1515_v51 = vmul.f32 %v2639_v34, %v1291_v27 }
 0x236   :  { %v1539_v56 = vadd.f32 %v1538_v44, %v1508_v13 }
 0x237   :  { %v1751_v24 = vpop.f32.mrb[28].mxu1  ;;  %v1261_v37 = vmul.f32 0.2, %v1171_v50  ;;  %vm1229_vm8 = vcmp.gt.f32.partialorder %v1171_v50, 0.0  ;;  %v1292_v43 = vsel %vm1228_vm7, %v1168_v17, %v1260_v47  ;;  %v1472_v46 = vpop.permute.xlu1 %1471 }
 0x238   :  { %v1752_v4 = vpop.f32.mrb[29].mxu1  ;;  %v1540_v1 = vadd.f32 %v1539_v56, %v1509_v12  ;;  %v873_v40 = vpop.permute.xlu0 %872  ;;  %v1516_v8 = vmul.f32 %v2647_v54, %v1292_v43 }
 0x239   :  { %v1753_v48 = vadd.f32 %v1752_v4, %v1751_v24  ;;  %v1754_v22 = vpop.f32.mrb[30].mxu1  ;;  %v1293_v23 = vsel %vm1229_vm8, %v1171_v50, %v1261_v37 }
 0x23a   :  { %v1755_v6 = vpop.f32.mrb[31].mxu1  ;;  %v1541_v53 = vadd.f32 %v1540_v1, %v1510_v15  ;;  %v1517_v44 = vmul.f32 %v2652_v25, %v1293_v23 }
 0x23b   :  { %v1756_v39 = vadd.f32 %v1755_v6, %v1754_v22  ;;  %v1176_v45 = vadd.f32 %v1753_v48, %v2548_v0 }
 0x23c   :  { %v1542_v20 = vadd.f32 %v1541_v53, %v1511_v52  ;;  %v878_v54 = vpop.permute.xlu0 %877  ;;  %v1477_v52 = vpop.permute.xlu1 %1476 }
 0x23d   :  { %v1179_v62 = vadd.f32 %v1756_v39, %v2550_v58  ;;  %vm1230_vm9 = vcmp.gt.f32.partialorder %v1176_v45, 0.0  ;;  %v1262_v0 = vmul.f32 0.2, %v1176_v45 }
 0x23e   :  { %v1543_v59 = vadd.f32 %v1542_v20, %v1512_v18 }
 0x23f   :  { %v1757_v33 = vpop.f32.mrb[32].mxu1  ;;  %v1263_v63 = vmul.f32 0.2, %v1179_v62  ;;  %vm1231_vm10 = vcmp.gt.f32.partialorder %v1179_v62, 0.0  ;;  %v1294_v34 = vsel %vm1230_vm9, %v1176_v45, %v1262_v0 }
 0x240   :  { %v1758_v49 = vpop.f32.mrb[33].mxu1  ;;  %v1544_v60 = vadd.f32 %v1543_v59, %v1513_v31  ;;  %v1518_v56 = vmul.f32 %v2659_v16, %v1294_v34  ;;  %v883_v50 = vpop.permute.xlu0 %882 }
 0x241   :  { %v1759_v32 = vadd.f32 %v1758_v49, %v1757_v33  ;;  %v1760_v14 = vpop.f32.mrb[34].mxu1  ;;  %v1295_v36 = vsel %vm1231_vm10, %v1179_v62, %v1263_v63  ;;  %v1482_v20 = vpop.permute.xlu1 %1481 }
 0x242   :  { %v1761_v3 = vpop.f32.mrb[35].mxu1  ;;  %v1545_v38 = vadd.f32 %v1544_v60, %v1514_v7  ;;  %v1519_v15 = vmul.f32 %v2661_v41, %v1295_v36 }
 0x243   :  { %v1184_v19 = vadd.f32 %v1759_v32, %v2552_v2  ;;  %v1762_v58 = vadd.f32 %v1761_v3, %v1760_v14 }
 0x244   :  { %v1546_v11 = vadd.f32 %v1545_v38, %v1515_v51  ;;  %v1487_v60 = vpop.permute.xlu0 %1486 }
 0x245   :  { %v1264_v13 = vmul.f32 0.2, %v1184_v19  ;;  %v1187_v12 = vadd.f32 %v1762_v58, %v2554_v28  ;;  %vm1232_vm11 = vcmp.gt.f32.partialorder %v1184_v19, 0.0  ;;  %v1492_v51 = vpop.permute.xlu1 %1491 }
 0x246   :  { %v1547_v61 = vadd.f32 %v1546_v11, %v1516_v8 }
 0x247   :  { %v1265_v9 = vmul.f32 0.2, %v1187_v12  ;;  %v1763_v29 = vpop.f32.mrb[36].mxu1  ;;  %vm1233_vm12 = vcmp.gt.f32.partialorder %v1187_v12, 0.0  ;;  %v1296_v30 = vsel %vm1232_vm11, %v1184_v19, %v1264_v13 }
 0x248   :  { %v1764_v2 = vpop.f32.mrb[37].mxu1  ;;  %v1548_v55 = vadd.f32 %v1547_v61, %v1517_v44  ;;  %v1520_v10 = vmul.f32 %v1467_v42, %v1296_v30 }
 0x249   :  { %v1765_v24 = vadd.f32 %v1764_v2, %v1763_v29  ;;  %v1766_v4 = vpop.f32.mrb[38].mxu1  ;;  %v1297_v48 = vsel %vm1233_vm12, %v1187_v12, %v1265_v9 }
 0x24a   :  { %v1767_v28 = vpop.f32.mrb[39].mxu1  ;;  %v1549_v1 = vadd.f32 %v1548_v55, %v1518_v56  ;;  %v1521_v6 = vmul.f32 %v1472_v46, %v1297_v48  ;;  %v1564_v46 = vstv %s2700_s6 }
 0x24b   :  { %v1192_v22 = vadd.f32 %v1765_v24, %v868_v21  ;;  %v1768_v25 = vadd.f32 %v1767_v28, %v1766_v4 }
 0x24c   :  { %v1550_v57 = vadd.f32 %v1549_v1, %v1519_v15 }
 0x24d   :  { %vm1234_vm13 = vcmp.gt.f32.partialorder %v1192_v22, 0.0  ;;  %v1266_v5 = vmul.f32 0.2, %v1192_v22  ;;  %v1195_v17 = vadd.f32 %v1768_v25, %v873_v40 }
 0x24e   :  { %v1551_v53 = vadd.f32 %v1550_v57, %v1520_v10 }
 0x24f   :  { %v1298_v16 = vsel %vm1234_vm13, %v1192_v22, %v1266_v5  ;;  %vm1235_vm14 = vcmp.gt.f32.partialorder %v1195_v17, 0.0  ;;  %v1267_v35 = vmul.f32 0.2, %v1195_v17  ;;  %v1769_v39 = vpop.f32.mrb[40].mxu1 }
 0x250   :  { %v1522_v18 = vmul.f32 %v1477_v52, %v1298_v16  ;;  %v1770_v41 = vpop.f32.mrb[41].mxu1  ;;  %v1552_v31 = vadd.f32 %v1551_v53, %v1521_v6 }
 0x251   :  { %v1299_v26 = vsel %vm1235_vm14, %v1195_v17, %v1267_v35  ;;  %v1771_v47 = vadd.f32 %v1770_v41, %v1769_v39  ;;  %v1772_v21 = vpop.f32.mrb[42].mxu1 }
 0x252   :  { %v1523_v45 = vmul.f32 %v1482_v20, %v1299_v26  ;;  %v1773_v42 = vpop.f32.mrb[43].mxu1  ;;  %v1553_v59 = vadd.f32 %v1552_v31, %v1522_v18 }
 0x253   :  { %v1200_v27 = vadd.f32 %v1771_v47, %v878_v54  ;;  %v1774_v62 = vadd.f32 %v1773_v42, %v1772_v21 }
 0x254   :  { %v1554_v33 = vadd.f32 %v1553_v59, %v1523_v45 }
 0x255   :  { %vm1236_vm15 = vcmp.gt.f32.partialorder %v1200_v27, 0.0  ;;  %v1268_v37 = vmul.f32 0.2, %v1200_v27  ;;  %v1203_v49 = vadd.f32 %v1774_v62, %v883_v50 }
 0x257   :  { %v1300_v7 = vsel %vm1236_vm15, %v1200_v27, %v1268_v37  ;;  %vm1237_vm0 = vcmp.gt.f32.partialorder %v1203_v49, 0.0  ;;  %v1269_v32 = vmul.f32 0.2, %v1203_v49 }
 0x258   :  { %v1524_v14 = vmul.f32 %v1487_v60, %v1300_v7 }
 0x259   :  { %v1301_v43 = vsel %vm1237_vm0, %v1203_v49, %v1269_v32 }
 0x25a   :  { %v1555_v0 = vadd.f32 %v1554_v33, %v1524_v14  ;;  %v1525_v3 = vmul.f32 %v1492_v51, %v1301_v43 }
 0x25c   :  { %v1556_v38 = vadd.f32 %v1555_v0, %v1525_v3 }
 0x25e   :  { %v1557_v63 = vrot.slane %v1556_v38, 4 }
 0x260   :  { %v1558_v19 = vadd.f32 %v1557_v63, %v1556_v38 }
 0x262   :  { %v1559_v58 = vrot.slane %v1558_v19, 2 }
 0x264   :  { %v1560_v40 = vadd.f32 %v1559_v58, %v1558_v19 }
 0x266   :  { %v1561_v23 = vrot.slane %v1560_v40, 1 }
 0x268   :  { %v1562_v11 = vadd.f32 %v1561_v23, %v1560_v40 }
 0x26a   :  { %v1565_v8 = vadd.f32 %v1564_v46, %v1562_v11 }
 0x26c   :  { %1566 = vst [vmem:[#allocation3] sm:$0x1] %v1565_v8 }
 0x26d   :  { %1906 = shalt.err (!%p1903_p4)
}
 0x26e   :  { %s1907_s1 = scalar_lea.hbm %s2701_s7, 16 }
 0x26f   :  { %p1908_p5 = scmp.ne.s32.totalorder %s2701_s7, %s1907_s1  ;;  %p1911_p6 = scmp.lt.u32.totalorder %s1907_s1, %s2701_s7 }
 0x271   :  { %p1913_p7 = pnand %p1911_p6, %p1908_p5 }
 0x273   :  { %1916 = shalt.err (!%p1913_p7)
}
 0x274   :  { %1576 = dma.vmem_to_hbm [thread:$0]  %s1574_s14, 16, %s2701_s7, [#allocation4]  }
 0x275   :  { %1917 = dma.done.wait [#allocation4], 16  }
 0x276   :  { %1918 = vsyncadd [#allocation4], 4294967280 }
 0x277   :  { %1580 = vsyncpa [#allocation4], 1 }

</bundles_post_ra>
